<compile_context>
chip_gen: v6e
topology: v6e:2x2x1
jax: 0.10.0
libtpu: 0.0.40
codegen_flags: <defaults>
</compile_context>

<pallas_src>
import jax
import jax.numpy as jnp
from jax.experimental import pallas as pl
from jax.experimental.pallas import tpu as pltpu

# ---- configuration (mirrors MouseNeuralNetwork.__init__) ----
NUM_FEATURES = 11     # conv1d input channels (num_features)
SEQ_LEN = 16          # length_single_mouse_traj (small example size)
FEAT_DIM = 512        # backbone feature dim == GRU input_size
HIDDEN = 25           # num_hidden_layer_gru
HP = 128              # per-gate lane slot width (vreg-aligned gate slices)
HPAD = 32             # padded contraction dim for hidden-sized matmuls (25 -> 32)
NUM_LAYERS = 3
REPEAT = 2            # len_lost_in_mousetraj_single
KSIZE = 3             # stand-in conv kernel size
NUM_CLASSES = 2
KC = KSIZE * NUM_FEATURES      # 33
KC_PAD = 48                    # im2col lanes padded to a bf16-friendly multiple of 16
BTILE = 8                      # batch tile per grid step


def mouse_net_kernel(xcol_ref, conv_w_ref, conv_b_ref,
                     wih0_ref, wih12_ref, whh_ref, ball_ref, bhhn_ref,
                     fcw_ref, fcb_ref, out_ref):
    """One batch tile per grid step; weights resident in VMEM (constant index_map).

    xcol_ref : (Bt*L, KC_PAD)   bf16  im2col'ed input  (conv == one matmul)
    conv_w   : (KC_PAD, 512)    bf16 ; conv_b (1, 512) f32
    wih0     : (512, 3*HP)      bf16  layer-0 input weights, gates at lanes 0/128/256
    wih12    : (2, HPAD, 3*HP)  bf16  layer-1/2 input weights (contraction de-padded to 32)
    whh      : (3, HPAD, 3*HP)  bf16  hidden weights, all layers (contraction de-padded)
    ball     : (3, 3*HP)        f32   fused biases: r/z slots = b_ih+b_hh, n slot = b_ih_n
    bhhn     : (3, HP)          f32   b_hh n-slot only (needed inside r*(W_hn h + b_hn))
    fcw      : (2, HPAD, HP)    bf16  fc2 split per time step, de-padded contraction
    fcb      : (1, HP)          f32
    out_ref  : (Bt, HP)         f32   lane-dense output slab; wrapper slices [:B, :2]
    """
    Bt = out_ref.shape[0]
    L = xcol_ref.shape[0] // Bt

    # ---- stand-in resnet50_1d backbone ----
    # TODO(synk): resnet50_1d definition is not provided in the reference source;
    # stand-in is conv1d(11->512, k=3, pad=1) + ReLU + global average pool.
    conv = jnp.dot(xcol_ref[...], conv_w_ref[...],
                   preferred_element_type=jnp.float32)            # (Bt*L, 512)
    conv = jnp.maximum(conv + conv_b_ref[...], 0.0)
    # f32 global average pool via reshape + sublane reduce (no pool matrix).
    feats = jnp.mean(conv.reshape(Bt, L, FEAT_DIM), axis=1)       # (Bt, 512)
    feats_bf = feats.astype(jnp.bfloat16)

    def gates_step0(gi, bhh_n):
        # First time step of a layer: h == 0, so the h@W_hh matmul and the z*h
        # term vanish (only the n-gate hidden bias survives).
        r = jax.nn.sigmoid(gi[:, 0:HP])
        z = jax.nn.sigmoid(gi[:, HP:2 * HP])
        n = jnp.tanh(gi[:, 2 * HP:3 * HP] + r * bhh_n)
        return (1.0 - z) * n                                       # padded lanes stay 0

    def gates_step(gi, h, whh, bhh_n):
        # Only the first HPAD lanes of h carry data; contraction de-padded to 32.
        gh = jnp.dot(h[:, :HPAD].astype(jnp.bfloat16), whh,
                     preferred_element_type=jnp.float32)           # (Bt, 3*HP)
        r = jax.nn.sigmoid(gi[:, 0:HP] + gh[:, 0:HP])
        z = jax.nn.sigmoid(gi[:, HP:2 * HP] + gh[:, HP:2 * HP])
        n = jnp.tanh(gi[:, 2 * HP:3 * HP] + r * (gh[:, 2 * HP:3 * HP] + bhh_n))
        return (1.0 - z) * n + z * h                                # padded lanes stay 0

    # ---- GRU layer 0: input == feats for both repeated steps -> gi computed once ----
    gi0 = jnp.dot(feats_bf, wih0_ref[...],
                  preferred_element_type=jnp.float32) + ball_ref[0:1, :]
    h_t0 = gates_step0(gi0, bhhn_ref[0:1, :])
    h_t1 = gates_step(gi0, h_t0, whh_ref[0], bhhn_ref[0:1, :])
    seq0, seq1 = h_t0, h_t1

    # ---- GRU layers 1..2: input projections batched over the two time steps ----
    for l in range(1, NUM_LAYERS):
        x2 = jnp.concatenate([seq0[:, :HPAD], seq1[:, :HPAD]], axis=0)   # (2*Bt, 32)
        gi = jnp.dot(x2.astype(jnp.bfloat16), wih12_ref[l - 1],
                     preferred_element_type=jnp.float32) + ball_ref[l:l + 1, :]
        h_t0 = gates_step0(gi[:Bt], bhhn_ref[l:l + 1, :])
        h_t1 = gates_step(gi[Bt:], h_t0, whh_ref[l], bhhn_ref[l:l + 1, :])
        seq0, seq1 = h_t0, h_t1

    # ---- flatten + dropout(identity) + fc2 (two small K=32 matmuls) ----
    # TODO(synk): nn.Dropout(0.25) is a no-op at inference; training-mode masking
    # is not implemented.
    out = jnp.dot(seq0[:, :HPAD].astype(jnp.bfloat16), fcw_ref[0],
                  preferred_element_type=jnp.float32)
    out = out + jnp.dot(seq1[:, :HPAD].astype(jnp.bfloat16), fcw_ref[1],
                        preferred_element_type=jnp.float32)
    out_ref[...] = out + fcb_ref[...]


# ----------------------------- wrapper-side layout -----------------------------

def _gate_pad_cols(w):
    """(in, 3*HIDDEN) -> (in, 3*HP): each gate moved to its own 128-lane slot."""
    out = jnp.zeros((w.shape[0], 3 * HP), w.dtype)
    for g in range(3):
        out = out.at[:, g * HP:g * HP + HIDDEN].set(w[:, g * HIDDEN:(g + 1) * HIDDEN])
    return out


def _pad_rows(w, rows):
    return jnp.pad(w, ((0, rows - w.shape[0]), (0, 0)))


def pack_params(params):
    """Convert math-spec (PyTorch-like) params to the kernel's packed/padded layout."""
    (conv_w, conv_b,
     wih0, whh0, bih0, bhh0,
     wih1, whh1, bih1, bhh1,
     wih2, whh2, bih2, bhh2,
     fcw, fcb) = params

    conv_w_p = jnp.zeros((KC_PAD, FEAT_DIM), jnp.float32)
    conv_w_p = conv_w_p.at[:KC].set(conv_w.reshape(KC, FEAT_DIM)).astype(jnp.bfloat16)
    conv_b_p = conv_b.astype(jnp.float32)

    wih0_p = _gate_pad_cols(wih0).astype(jnp.bfloat16)                        # (512, 384)
    wih12_p = jnp.stack([_pad_rows(_gate_pad_cols(wih1), HPAD),
                         _pad_rows(_gate_pad_cols(wih2), HPAD)]).astype(jnp.bfloat16)
    whh_p = jnp.stack([_pad_rows(_gate_pad_cols(w), HPAD)
                       for w in (whh0, whh1, whh2)]).astype(jnp.bfloat16)

    # Fused biases: r/z gate slots carry b_ih + b_hh; n slot carries b_ih only.
    # b_hh n-slot is kept separately (needed inside r * (W_hn h + b_hn)).
    b_all_rows, bhh_n_rows = [], []
    for (bih, bhh) in ((bih0, bhh0), (bih1, bhh1), (bih2, bhh2)):
        row = jnp.zeros((1, 3 * HP), jnp.float32)
        row = row.at[:, 0:HIDDEN].set(bih[:, 0:HIDDEN] + bhh[:, 0:HIDDEN])
        row = row.at[:, HP:HP + HIDDEN].set(
            bih[:, HIDDEN:2 * HIDDEN] + bhh[:, HIDDEN:2 * HIDDEN])
        row = row.at[:, 2 * HP:2 * HP + HIDDEN].set(bih[:, 2 * HIDDEN:3 * HIDDEN])
        b_all_rows.append(row)
        bn = jnp.zeros((1, HP), jnp.float32)
        bhh_n_rows.append(bn.at[:, :HIDDEN].set(bhh[:, 2 * HIDDEN:3 * HIDDEN]))
    b_all_p = jnp.concatenate(b_all_rows, axis=0)          # (3, 384)
    bhh_n_p = jnp.concatenate(bhh_n_rows, axis=0)          # (3, 128)

    # fc2 split per time step; contraction de-padded to HPAD rows, output lane-dense.
    fcw_t = jnp.stack([fcw[:HIDDEN], fcw[HIDDEN:]])                   # (2, 25, 2)
    fcw_p = jnp.zeros((REPEAT, HPAD, HP), jnp.float32)
    fcw_p = fcw_p.at[:, :HIDDEN, :NUM_CLASSES].set(fcw_t).astype(jnp.bfloat16)
    fcb_p = jnp.zeros((1, HP), jnp.float32).at[:, :NUM_CLASSES].set(fcb)

    return (conv_w_p, conv_b_p, wih0_p, wih12_p, whh_p, b_all_p, bhh_n_p, fcw_p, fcb_p)


def mouse_forward(x_ncw, params):
    """x_ncw: (B, NUM_FEATURES, L) float32, PyTorch NCW layout."""
    B, _, L = x_ncw.shape
    Bp = ((B + BTILE - 1) // BTILE) * BTILE
    n_tiles = Bp // BTILE

    # --- layout plumbing (wrapper-side glue, not compute) ---
    x_nwc = jnp.transpose(x_ncw, (0, 2, 1)).astype(jnp.float32)      # NCW -> NWC
    x_nwc = jnp.pad(x_nwc, ((0, Bp - B), (0, 0), (0, 0)))
    pad = (KSIZE - 1) // 2
    x_p = jnp.pad(x_nwc, ((0, 0), (pad, pad), (0, 0)))
    x_col = jnp.concatenate([x_p[:, k:k + L, :] for k in range(KSIZE)], axis=-1)
    x_col = x_col.reshape(Bp * L, KC)
    x_col = jnp.pad(x_col, ((0, 0), (0, KC_PAD - KC))).astype(jnp.bfloat16)

    args = (x_col,) + pack_params(params)

    # Weights use constant index_maps -> DMA'd once, VMEM-resident across the grid.
    in_specs = [
        pl.BlockSpec((BTILE * L, KC_PAD), lambda b: (b, 0)),          # x_col (per tile)
        pl.BlockSpec((KC_PAD, FEAT_DIM), lambda b: (0, 0)),           # conv_w
        pl.BlockSpec((1, FEAT_DIM), lambda b: (0, 0)),                # conv_b
        pl.BlockSpec((FEAT_DIM, 3 * HP), lambda b: (0, 0)),           # wih0
        pl.BlockSpec((REPEAT, HPAD, 3 * HP), lambda b: (0, 0, 0)),    # wih12
        pl.BlockSpec((NUM_LAYERS, HPAD, 3 * HP), lambda b: (0, 0, 0)),# whh
        pl.BlockSpec((NUM_LAYERS, 3 * HP), lambda b: (0, 0)),         # b_all (fused)
        pl.BlockSpec((NUM_LAYERS, HP), lambda b: (0, 0)),             # bhh_n
        pl.BlockSpec((REPEAT, HPAD, HP), lambda b: (0, 0, 0)),        # fcw
        pl.BlockSpec((1, HP), lambda b: (0, 0)),                      # fcb
    ]
    out_specs = pl.BlockSpec((BTILE, HP), lambda b: (b, 0))

    # TODO(synk): if this kernel is called repeatedly, prefetch the ~0.5 MB of weights
    # across calls (P10 semaphore/VMEM future) so the weight DMA is fully hidden.
    out = pl.pallas_call(
        mouse_net_kernel,
        out_shape=jax.ShapeDtypeStruct((Bp, HP), jnp.float32),
        grid=(n_tiles,),
        in_specs=in_specs,
        out_specs=out_specs,
        compiler_params=pltpu.CompilerParams(
            dimension_semantics=("parallel",)),
    )(*args)
    return out[:B, :NUM_CLASSES]


# ----------------------------- params & reference ------------------------------

def init_params(key):
    ks = jax.random.split(key, 16)

    def rnd(k, shape, scale=0.05):
        return jax.random.normal(k, shape, jnp.float32) * scale

    params = [rnd(ks[0], (KSIZE, NUM_FEATURES, FEAT_DIM)),   # conv_w
              rnd(ks[1], (1, FEAT_DIM))]                     # conv_b
    in_dims = [FEAT_DIM, HIDDEN, HIDDEN]
    i = 2
    for l in range(NUM_LAYERS):
        params.append(rnd(ks[i], (in_dims[l], 3 * HIDDEN))); i += 1   # w_ih (transposed)
        params.append(rnd(ks[i], (HIDDEN, 3 * HIDDEN)));     i += 1   # w_hh (transposed)
        params.append(rnd(ks[i], (1, 3 * HIDDEN)));          i += 1   # b_ih
        params.append(rnd(ks[i], (1, 3 * HIDDEN)));          i += 1   # b_hh
    params.append(rnd(ks[14], (REPEAT * HIDDEN, NUM_CLASSES)))        # fc2 weight (transposed)
    params.append(rnd(ks[15], (1, NUM_CLASSES)))                      # fc2 bias
    return tuple(params)


def ref_forward(x_ncw, params, mxu_dtype=jnp.float32):
    """Pure-JAX reference. mxu_dtype=bfloat16 mirrors the kernel's MXU precision."""
    (conv_w, conv_b,
     wih0, whh0, bih0, bhh0,
     wih1, whh1, bih1, bhh1,
     wih2, whh2, bih2, bhh2,
     fcw, fcb) = params
    B, _, L = x_ncw.shape

    def mm(a, b):
        return jnp.dot(a.astype(mxu_dtype), b.astype(mxu_dtype),
                       preferred_element_type=jnp.float32)

    x = jnp.transpose(x_ncw, (0, 2, 1))
    pad = (KSIZE - 1) // 2
    xp = jnp.pad(x, ((0, 0), (pad, pad), (0, 0)))
    x_col = jnp.concatenate([xp[:, k:k + L, :] for k in range(KSIZE)], axis=-1)
    x_col = x_col.reshape(B * L, KC)
    conv = jnp.maximum(mm(x_col, conv_w.reshape(KC, FEAT_DIM)) + conv_b, 0.0)
    feats = jnp.mean(conv.reshape(B, L, FEAT_DIM), axis=1)    # f32 mean (matches kernel)

    def cell(x_t, h, wih, whh, bih, bhh):
        gi = mm(x_t, wih) + bih
        gh = mm(h, whh) + bhh
        r = jax.nn.sigmoid(gi[:, :HIDDEN] + gh[:, :HIDDEN])
        z = jax.nn.sigmoid(gi[:, HIDDEN:2 * HIDDEN] + gh[:, HIDDEN:2 * HIDDEN])
        n = jnp.tanh(gi[:, 2 * HIDDEN:] + r * gh[:, 2 * HIDDEN:])
        return (1.0 - z) * n + z * h

    seq = [feats] * REPEAT
    for (wih, whh, bih, bhh) in [(wih0, whh0, bih0, bhh0),
                                 (wih1, whh1, bih1, bhh1),
                                 (wih2, whh2, bih2, bhh2)]:
        h = jnp.zeros((B, HIDDEN), jnp.float32)
        new = []
        for t in range(REPEAT):
            h = cell(seq[t], h, wih, whh, bih, bhh)
            new.append(h)
        seq = new
    return mm(jnp.concatenate(seq, axis=-1), fcw) + fcb


if __name__ == "__main__":
    key = jax.random.PRNGKey(0)
    pkey, xkey = jax.random.split(key)
    params = init_params(pkey)
    x = jax.random.normal(xkey, (2, NUM_FEATURES, SEQ_LEN), jnp.float32)   # NCW input

    out = jax.block_until_ready(jax.jit(mouse_forward)(x, params))
    ref_bf16 = ref_forward(x, params, mxu_dtype=jnp.bfloat16)   # same MXU precision path
    ref_f32 = ref_forward(x, params, mxu_dtype=jnp.float32)     # full-precision semantics

    assert out.shape == (2, NUM_CLASSES), out.shape
    assert jnp.allclose(out, ref_bf16, atol=2e-3, rtol=2e-2), (out, ref_bf16)
    assert jnp.allclose(out, ref_f32, atol=3e-2, rtol=3e-2), (out, ref_f32)
    print("KERNEL_OK")
</pallas_src>

<mosaic_0001>
module attributes {stable_mosaic.version = 11 : i64} {
  func.func @mouse_net_kernel(%arg0: i32, %arg1: memref<128x48xbf16, #tpu.memory_space<vmem>>, %arg2: memref<48x512xbf16, #tpu.memory_space<vmem>>, %arg3: memref<1x512xf32, #tpu.memory_space<vmem>>, %arg4: memref<512x384xbf16, #tpu.memory_space<vmem>>, %arg5: memref<2x32x384xbf16, #tpu.memory_space<vmem>>, %arg6: memref<3x32x384xbf16, #tpu.memory_space<vmem>>, %arg7: memref<3x384xf32, #tpu.memory_space<vmem>>, %arg8: memref<3x128xf32, #tpu.memory_space<vmem>>, %arg9: memref<2x32x128xbf16, #tpu.memory_space<vmem>>, %arg10: memref<1x128xf32, #tpu.memory_space<vmem>>, %arg11: memref<8x128xf32, #tpu.memory_space<vmem>>) attributes {dimension_semantics = [#tpu.dimension_semantics<parallel>], iteration_bounds = array<i64: 1>, scalar_prefetch = 0 : i64, scratch_operands = 0 : i64, tpu.core_type = #tpu.core_type<tc>, window_params = [{transform_indices = @transform_0, window_bounds = array<i64: 128, 48>}, {pipeline_mode = #tpu.pipeline_mode<synchronous>, transform_indices = @transform_1, window_bounds = array<i64: 48, 512>}, {pipeline_mode = #tpu.pipeline_mode<synchronous>, transform_indices = @transform_2, window_bounds = array<i64: 1, 512>}, {pipeline_mode = #tpu.pipeline_mode<synchronous>, transform_indices = @transform_3, window_bounds = array<i64: 512, 384>}, {pipeline_mode = #tpu.pipeline_mode<synchronous>, transform_indices = @transform_4, window_bounds = array<i64: 2, 32, 384>}, {pipeline_mode = #tpu.pipeline_mode<synchronous>, transform_indices = @transform_5, window_bounds = array<i64: 3, 32, 384>}, {pipeline_mode = #tpu.pipeline_mode<synchronous>, transform_indices = @transform_6, window_bounds = array<i64: 3, 384>}, {pipeline_mode = #tpu.pipeline_mode<synchronous>, transform_indices = @transform_7, window_bounds = array<i64: 3, 128>}, {pipeline_mode = #tpu.pipeline_mode<synchronous>, transform_indices = @transform_8, window_bounds = array<i64: 2, 32, 128>}, {pipeline_mode = #tpu.pipeline_mode<synchronous>, transform_indices = @transform_9, window_bounds = array<i64: 1, 128>}, {transform_indices = @transform_10, window_bounds = array<i64: 8, 128>}]} {
    %c0 = arith.constant 0 : index
    %c0_0 = arith.constant 0 : index
    %0 = vector.load %arg1[%c0, %c0_0] : memref<128x48xbf16, #tpu.memory_space<vmem>>, vector<128x48xbf16>
    %c0_1 = arith.constant 0 : index
    %c0_2 = arith.constant 0 : index
    %1 = vector.load %arg2[%c0_1, %c0_2] : memref<48x512xbf16, #tpu.memory_space<vmem>>, vector<48x512xbf16>
    %cst = arith.constant dense<0.000000e+00> : vector<128x512xf32>
    %2 = tpu.matmul %0, %1, %cst {dimension_numbers = #tpu.dot_dimension_numbers<[1], [0], [0], [1], [0, 0, 1, 1], [], []>} : vector<128x48xbf16>, vector<48x512xbf16>, vector<128x512xf32> -> vector<128x512xf32>
    %c0_3 = arith.constant 0 : index
    %c0_4 = arith.constant 0 : index
    %3 = vector.load %arg3[%c0_3, %c0_4] : memref<1x512xf32, #tpu.memory_space<vmem>>, vector<1x512xf32>
    %4 = vector.broadcast %3 : vector<1x512xf32> to vector<128x512xf32>
    %5 = arith.addf %2, %4 : vector<128x512xf32>
    %cst_5 = arith.constant 0.000000e+00 : f32
    %6 = vector.broadcast %cst_5 : f32 to vector<128x512xf32>
    %7 = arith.maximumf %5, %6 : vector<128x512xf32>
    %8 = vector.shape_cast %7 : vector<128x512xf32> to vector<8x16x512xf32>
    %cst_6 = arith.constant dense<0.000000e+00> : vector<8x512xf32>
    %9 = vector.multi_reduction <add>, %8, %cst_6 [1] : vector<8x16x512xf32> to vector<8x512xf32>
    %cst_7 = arith.constant 1.600000e+01 : f32
    %10 = vector.broadcast %cst_7 : f32 to vector<8x512xf32>
    %11 = arith.divf %9, %10 : vector<8x512xf32>
    %12 = arith.truncf %11 : vector<8x512xf32> to vector<8x512xbf16>
    %c0_8 = arith.constant 0 : index
    %c0_9 = arith.constant 0 : index
    %13 = vector.load %arg4[%c0_8, %c0_9] : memref<512x384xbf16, #tpu.memory_space<vmem>>, vector<512x384xbf16>
    %cst_10 = arith.constant dense<0.000000e+00> : vector<8x384xf32>
    %14 = tpu.matmul %12, %13, %cst_10 {dimension_numbers = #tpu.dot_dimension_numbers<[1], [0], [0], [1], [0, 0, 1, 1], [], []>} : vector<8x512xbf16>, vector<512x384xbf16>, vector<8x384xf32> -> vector<8x384xf32>
    %c0_11 = arith.constant 0 : index
    %c0_12 = arith.constant 0 : index
    %15 = vector.load %arg7[%c0_11, %c0_12] : memref<3x384xf32, #tpu.memory_space<vmem>>, vector<1x384xf32>
    %16 = vector.broadcast %15 : vector<1x384xf32> to vector<8x384xf32>
    %17 = arith.addf %14, %16 : vector<8x384xf32>
    %c0_13 = arith.constant 0 : index
    %c0_14 = arith.constant 0 : index
    %18 = vector.load %arg8[%c0_13, %c0_14] : memref<3x128xf32, #tpu.memory_space<vmem>>, vector<1x128xf32>
    %19 = vector.extract_strided_slice %17 {offsets = [0, 0], sizes = [8, 128], strides = [1, 1]} : vector<8x384xf32> to vector<8x128xf32>
    %20 = arith.negf %19 : vector<8x128xf32>
    %21 = math.exp %20 : vector<8x128xf32>
    %cst_15 = arith.constant 1.000000e+00 : f32
    %22 = vector.broadcast %cst_15 : f32 to vector<8x128xf32>
    %23 = arith.addf %22, %21 : vector<8x128xf32>
    %24 = arith.divf %22, %23 : vector<8x128xf32>
    %25 = vector.extract_strided_slice %17 {offsets = [0, 128], sizes = [8, 128], strides = [1, 1]} : vector<8x384xf32> to vector<8x128xf32>
    %26 = arith.negf %25 : vector<8x128xf32>
    %27 = math.exp %26 : vector<8x128xf32>
    %cst_16 = arith.constant 1.000000e+00 : f32
    %28 = vector.broadcast %cst_16 : f32 to vector<8x128xf32>
    %29 = arith.addf %28, %27 : vector<8x128xf32>
    %30 = arith.divf %28, %29 : vector<8x128xf32>
    %31 = vector.extract_strided_slice %17 {offsets = [0, 256], sizes = [8, 128], strides = [1, 1]} : vector<8x384xf32> to vector<8x128xf32>
    %32 = vector.broadcast %18 : vector<1x128xf32> to vector<8x128xf32>
    %33 = arith.mulf %24, %32 : vector<8x128xf32>
    %34 = arith.addf %31, %33 : vector<8x128xf32>
    %35 = math.tanh %34 : vector<8x128xf32>
    %cst_17 = arith.constant 1.000000e+00 : f32
    %36 = vector.broadcast %cst_17 : f32 to vector<8x128xf32>
    %37 = arith.subf %36, %30 : vector<8x128xf32>
    %38 = arith.mulf %37, %35 : vector<8x128xf32>
    %c0_18 = arith.constant 0 : index
    %c0_19 = arith.constant 0 : index
    %c0_20 = arith.constant 0 : index
    %39 = vector.load %arg6[%c0_18, %c0_19, %c0_20] : memref<3x32x384xbf16, #tpu.memory_space<vmem>>, vector<1x32x384xbf16>
    %40 = vector.shape_cast %39 : vector<1x32x384xbf16> to vector<32x384xbf16>
    %c0_21 = arith.constant 0 : index
    %c0_22 = arith.constant 0 : index
    %41 = vector.load %arg8[%c0_21, %c0_22] : memref<3x128xf32, #tpu.memory_space<vmem>>, vector<1x128xf32>
    %42 = vector.extract_strided_slice %38 {offsets = [0, 0], sizes = [8, 32], strides = [1, 1]} : vector<8x128xf32> to vector<8x32xf32>
    %43 = arith.truncf %42 : vector<8x32xf32> to vector<8x32xbf16>
    %cst_23 = arith.constant dense<0.000000e+00> : vector<8x384xf32>
    %44 = tpu.matmul %43, %40, %cst_23 {dimension_numbers = #tpu.dot_dimension_numbers<[1], [0], [0], [1], [0, 0, 1, 1], [], []>} : vector<8x32xbf16>, vector<32x384xbf16>, vector<8x384xf32> -> vector<8x384xf32>
    %45 = vector.extract_strided_slice %17 {offsets = [0, 0], sizes = [8, 128], strides = [1, 1]} : vector<8x384xf32> to vector<8x128xf32>
    %46 = vector.extract_strided_slice %44 {offsets = [0, 0], sizes = [8, 128], strides = [1, 1]} : vector<8x384xf32> to vector<8x128xf32>
    %47 = arith.addf %45, %46 : vector<8x128xf32>
    %48 = arith.negf %47 : vector<8x128xf32>
    %49 = math.exp %48 : vector<8x128xf32>
    %cst_24 = arith.constant 1.000000e+00 : f32
    %50 = vector.broadcast %cst_24 : f32 to vector<8x128xf32>
    %51 = arith.addf %50, %49 : vector<8x128xf32>
    %52 = arith.divf %50, %51 : vector<8x128xf32>
    %53 = vector.extract_strided_slice %17 {offsets = [0, 128], sizes = [8, 128], strides = [1, 1]} : vector<8x384xf32> to vector<8x128xf32>
    %54 = vector.extract_strided_slice %44 {offsets = [0, 128], sizes = [8, 128], strides = [1, 1]} : vector<8x384xf32> to vector<8x128xf32>
    %55 = arith.addf %53, %54 : vector<8x128xf32>
    %56 = arith.negf %55 : vector<8x128xf32>
    %57 = math.exp %56 : vector<8x128xf32>
    %cst_25 = arith.constant 1.000000e+00 : f32
    %58 = vector.broadcast %cst_25 : f32 to vector<8x128xf32>
    %59 = arith.addf %58, %57 : vector<8x128xf32>
    %60 = arith.divf %58, %59 : vector<8x128xf32>
    %61 = vector.extract_strided_slice %17 {offsets = [0, 256], sizes = [8, 128], strides = [1, 1]} : vector<8x384xf32> to vector<8x128xf32>
    %62 = vector.extract_strided_slice %44 {offsets = [0, 256], sizes = [8, 128], strides = [1, 1]} : vector<8x384xf32> to vector<8x128xf32>
    %63 = vector.broadcast %41 : vector<1x128xf32> to vector<8x128xf32>
    %64 = arith.addf %62, %63 : vector<8x128xf32>
    %65 = arith.mulf %52, %64 : vector<8x128xf32>
    %66 = arith.addf %61, %65 : vector<8x128xf32>
    %67 = math.tanh %66 : vector<8x128xf32>
    %cst_26 = arith.constant 1.000000e+00 : f32
    %68 = vector.broadcast %cst_26 : f32 to vector<8x128xf32>
    %69 = arith.subf %68, %60 : vector<8x128xf32>
    %70 = arith.mulf %69, %67 : vector<8x128xf32>
    %71 = arith.mulf %60, %38 : vector<8x128xf32>
    %72 = arith.addf %70, %71 : vector<8x128xf32>
    %73 = vector.extract_strided_slice %38 {offsets = [0, 0], sizes = [8, 32], strides = [1, 1]} : vector<8x128xf32> to vector<8x32xf32>
    %74 = vector.extract_strided_slice %72 {offsets = [0, 0], sizes = [8, 32], strides = [1, 1]} : vector<8x128xf32> to vector<8x32xf32>
    %75 = tpu.concatenate %73, %74 in 0 : vector<8x32xf32>, vector<8x32xf32> -> vector<16x32xf32>
    %76 = arith.truncf %75 : vector<16x32xf32> to vector<16x32xbf16>
    %c0_27 = arith.constant 0 : index
    %c0_28 = arith.constant 0 : index
    %c0_29 = arith.constant 0 : index
    %77 = vector.load %arg5[%c0_27, %c0_28, %c0_29] : memref<2x32x384xbf16, #tpu.memory_space<vmem>>, vector<1x32x384xbf16>
    %78 = vector.shape_cast %77 : vector<1x32x384xbf16> to vector<32x384xbf16>
    %cst_30 = arith.constant dense<0.000000e+00> : vector<16x384xf32>
    %79 = tpu.matmul %76, %78, %cst_30 {dimension_numbers = #tpu.dot_dimension_numbers<[1], [0], [0], [1], [0, 0, 1, 1], [], []>} : vector<16x32xbf16>, vector<32x384xbf16>, vector<16x384xf32> -> vector<16x384xf32>
    %c1 = arith.constant 1 : index
    %c0_31 = arith.constant 0 : index
    %80 = vector.load %arg7[%c1, %c0_31] : memref<3x384xf32, #tpu.memory_space<vmem>>, vector<1x384xf32>
    %81 = vector.broadcast %80 : vector<1x384xf32> to vector<16x384xf32>
    %82 = arith.addf %79, %81 : vector<16x384xf32>
    %83 = vector.extract_strided_slice %82 {offsets = [0, 0], sizes = [8, 384], strides = [1, 1]} : vector<16x384xf32> to vector<8x384xf32>
    %c1_32 = arith.constant 1 : index
    %c0_33 = arith.constant 0 : index
    %84 = vector.load %arg8[%c1_32, %c0_33] : memref<3x128xf32, #tpu.memory_space<vmem>>, vector<1x128xf32>
    %85 = vector.extract_strided_slice %83 {offsets = [0, 0], sizes = [8, 128], strides = [1, 1]} : vector<8x384xf32> to vector<8x128xf32>
    %86 = arith.negf %85 : vector<8x128xf32>
    %87 = math.exp %86 : vector<8x128xf32>
    %cst_34 = arith.constant 1.000000e+00 : f32
    %88 = vector.broadcast %cst_34 : f32 to vector<8x128xf32>
    %89 = arith.addf %88, %87 : vector<8x128xf32>
    %90 = arith.divf %88, %89 : vector<8x128xf32>
    %91 = vector.extract_strided_slice %83 {offsets = [0, 128], sizes = [8, 128], strides = [1, 1]} : vector<8x384xf32> to vector<8x128xf32>
    %92 = arith.negf %91 : vector<8x128xf32>
    %93 = math.exp %92 : vector<8x128xf32>
    %cst_35 = arith.constant 1.000000e+00 : f32
    %94 = vector.broadcast %cst_35 : f32 to vector<8x128xf32>
    %95 = arith.addf %94, %93 : vector<8x128xf32>
    %96 = arith.divf %94, %95 : vector<8x128xf32>
    %97 = vector.extract_strided_slice %83 {offsets = [0, 256], sizes = [8, 128], strides = [1, 1]} : vector<8x384xf32> to vector<8x128xf32>
    %98 = vector.broadcast %84 : vector<1x128xf32> to vector<8x128xf32>
    %99 = arith.mulf %90, %98 : vector<8x128xf32>
    %100 = arith.addf %97, %99 : vector<8x128xf32>
    %101 = math.tanh %100 : vector<8x128xf32>
    %cst_36 = arith.constant 1.000000e+00 : f32
    %102 = vector.broadcast %cst_36 : f32 to vector<8x128xf32>
    %103 = arith.subf %102, %96 : vector<8x128xf32>
    %104 = arith.mulf %103, %101 : vector<8x128xf32>
    %105 = vector.extract_strided_slice %82 {offsets = [8, 0], sizes = [8, 384], strides = [1, 1]} : vector<16x384xf32> to vector<8x384xf32>
    %c1_37 = arith.constant 1 : index
    %c0_38 = arith.constant 0 : index
    %c0_39 = arith.constant 0 : index
    %106 = vector.load %arg6[%c1_37, %c0_38, %c0_39] : memref<3x32x384xbf16, #tpu.memory_space<vmem>>, vector<1x32x384xbf16>
    %107 = vector.shape_cast %106 : vector<1x32x384xbf16> to vector<32x384xbf16>
    %c1_40 = arith.constant 1 : index
    %c0_41 = arith.constant 0 : index
    %108 = vector.load %arg8[%c1_40, %c0_41] : memref<3x128xf32, #tpu.memory_space<vmem>>, vector<1x128xf32>
    %109 = vector.extract_strided_slice %104 {offsets = [0, 0], sizes = [8, 32], strides = [1, 1]} : vector<8x128xf32> to vector<8x32xf32>
    %110 = arith.truncf %109 : vector<8x32xf32> to vector<8x32xbf16>
    %cst_42 = arith.constant dense<0.000000e+00> : vector<8x384xf32>
    %111 = tpu.matmul %110, %107, %cst_42 {dimension_numbers = #tpu.dot_dimension_numbers<[1], [0], [0], [1], [0, 0, 1, 1], [], []>} : vector<8x32xbf16>, vector<32x384xbf16>, vector<8x384xf32> -> vector<8x384xf32>
    %112 = vector.extract_strided_slice %105 {offsets = [0, 0], sizes = [8, 128], strides = [1, 1]} : vector<8x384xf32> to vector<8x128xf32>
    %113 = vector.extract_strided_slice %111 {offsets = [0, 0], sizes = [8, 128], strides = [1, 1]} : vector<8x384xf32> to vector<8x128xf32>
    %114 = arith.addf %112, %113 : vector<8x128xf32>
    %115 = arith.negf %114 : vector<8x128xf32>
    %116 = math.exp %115 : vector<8x128xf32>
    %cst_43 = arith.constant 1.000000e+00 : f32
    %117 = vector.broadcast %cst_43 : f32 to vector<8x128xf32>
    %118 = arith.addf %117, %116 : vector<8x128xf32>
    %119 = arith.divf %117, %118 : vector<8x128xf32>
    %120 = vector.extract_strided_slice %105 {offsets = [0, 128], sizes = [8, 128], strides = [1, 1]} : vector<8x384xf32> to vector<8x128xf32>
    %121 = vector.extract_strided_slice %111 {offsets = [0, 128], sizes = [8, 128], strides = [1, 1]} : vector<8x384xf32> to vector<8x128xf32>
    %122 = arith.addf %120, %121 : vector<8x128xf32>
    %123 = arith.negf %122 : vector<8x128xf32>
    %124 = math.exp %123 : vector<8x128xf32>
    %cst_44 = arith.constant 1.000000e+00 : f32
    %125 = vector.broadcast %cst_44 : f32 to vector<8x128xf32>
    %126 = arith.addf %125, %124 : vector<8x128xf32>
    %127 = arith.divf %125, %126 : vector<8x128xf32>
    %128 = vector.extract_strided_slice %105 {offsets = [0, 256], sizes = [8, 128], strides = [1, 1]} : vector<8x384xf32> to vector<8x128xf32>
    %129 = vector.extract_strided_slice %111 {offsets = [0, 256], sizes = [8, 128], strides = [1, 1]} : vector<8x384xf32> to vector<8x128xf32>
    %130 = vector.broadcast %108 : vector<1x128xf32> to vector<8x128xf32>
    %131 = arith.addf %129, %130 : vector<8x128xf32>
    %132 = arith.mulf %119, %131 : vector<8x128xf32>
    %133 = arith.addf %128, %132 : vector<8x128xf32>
    %134 = math.tanh %133 : vector<8x128xf32>
    %cst_45 = arith.constant 1.000000e+00 : f32
    %135 = vector.broadcast %cst_45 : f32 to vector<8x128xf32>
    %136 = arith.subf %135, %127 : vector<8x128xf32>
    %137 = arith.mulf %136, %134 : vector<8x128xf32>
    %138 = arith.mulf %127, %104 : vector<8x128xf32>
    %139 = arith.addf %137, %138 : vector<8x128xf32>
    %140 = vector.extract_strided_slice %104 {offsets = [0, 0], sizes = [8, 32], strides = [1, 1]} : vector<8x128xf32> to vector<8x32xf32>
    %141 = vector.extract_strided_slice %139 {offsets = [0, 0], sizes = [8, 32], strides = [1, 1]} : vector<8x128xf32> to vector<8x32xf32>
    %142 = tpu.concatenate %140, %141 in 0 : vector<8x32xf32>, vector<8x32xf32> -> vector<16x32xf32>
    %143 = arith.truncf %142 : vector<16x32xf32> to vector<16x32xbf16>
    %c1_46 = arith.constant 1 : index
    %c0_47 = arith.constant 0 : index
    %c0_48 = arith.constant 0 : index
    %144 = vector.load %arg5[%c1_46, %c0_47, %c0_48] : memref<2x32x384xbf16, #tpu.memory_space<vmem>>, vector<1x32x384xbf16>
    %145 = vector.shape_cast %144 : vector<1x32x384xbf16> to vector<32x384xbf16>
    %cst_49 = arith.constant dense<0.000000e+00> : vector<16x384xf32>
    %146 = tpu.matmul %143, %145, %cst_49 {dimension_numbers = #tpu.dot_dimension_numbers<[1], [0], [0], [1], [0, 0, 1, 1], [], []>} : vector<16x32xbf16>, vector<32x384xbf16>, vector<16x384xf32> -> vector<16x384xf32>
    %c2 = arith.constant 2 : index
    %c0_50 = arith.constant 0 : index
    %147 = vector.load %arg7[%c2, %c0_50] : memref<3x384xf32, #tpu.memory_space<vmem>>, vector<1x384xf32>
    %148 = vector.broadcast %147 : vector<1x384xf32> to vector<16x384xf32>
    %149 = arith.addf %146, %148 : vector<16x384xf32>
    %150 = vector.extract_strided_slice %149 {offsets = [0, 0], sizes = [8, 384], strides = [1, 1]} : vector<16x384xf32> to vector<8x384xf32>
    %c2_51 = arith.constant 2 : index
    %c0_52 = arith.constant 0 : index
    %151 = vector.load %arg8[%c2_51, %c0_52] : memref<3x128xf32, #tpu.memory_space<vmem>>, vector<1x128xf32>
    %152 = vector.extract_strided_slice %150 {offsets = [0, 0], sizes = [8, 128], strides = [1, 1]} : vector<8x384xf32> to vector<8x128xf32>
    %153 = arith.negf %152 : vector<8x128xf32>
    %154 = math.exp %153 : vector<8x128xf32>
    %cst_53 = arith.constant 1.000000e+00 : f32
    %155 = vector.broadcast %cst_53 : f32 to vector<8x128xf32>
    %156 = arith.addf %155, %154 : vector<8x128xf32>
    %157 = arith.divf %155, %156 : vector<8x128xf32>
    %158 = vector.extract_strided_slice %150 {offsets = [0, 128], sizes = [8, 128], strides = [1, 1]} : vector<8x384xf32> to vector<8x128xf32>
    %159 = arith.negf %158 : vector<8x128xf32>
    %160 = math.exp %159 : vector<8x128xf32>
    %cst_54 = arith.constant 1.000000e+00 : f32
    %161 = vector.broadcast %cst_54 : f32 to vector<8x128xf32>
    %162 = arith.addf %161, %160 : vector<8x128xf32>
    %163 = arith.divf %161, %162 : vector<8x128xf32>
    %164 = vector.extract_strided_slice %150 {offsets = [0, 256], sizes = [8, 128], strides = [1, 1]} : vector<8x384xf32> to vector<8x128xf32>
    %165 = vector.broadcast %151 : vector<1x128xf32> to vector<8x128xf32>
    %166 = arith.mulf %157, %165 : vector<8x128xf32>
    %167 = arith.addf %164, %166 : vector<8x128xf32>
    %168 = math.tanh %167 : vector<8x128xf32>
    %cst_55 = arith.constant 1.000000e+00 : f32
    %169 = vector.broadcast %cst_55 : f32 to vector<8x128xf32>
    %170 = arith.subf %169, %163 : vector<8x128xf32>
    %171 = arith.mulf %170, %168 : vector<8x128xf32>
    %172 = vector.extract_strided_slice %149 {offsets = [8, 0], sizes = [8, 384], strides = [1, 1]} : vector<16x384xf32> to vector<8x384xf32>
    %c2_56 = arith.constant 2 : index
    %c0_57 = arith.constant 0 : index
    %c0_58 = arith.constant 0 : index
    %173 = vector.load %arg6[%c2_56, %c0_57, %c0_58] : memref<3x32x384xbf16, #tpu.memory_space<vmem>>, vector<1x32x384xbf16>
    %174 = vector.shape_cast %173 : vector<1x32x384xbf16> to vector<32x384xbf16>
    %c2_59 = arith.constant 2 : index
    %c0_60 = arith.constant 0 : index
    %175 = vector.load %arg8[%c2_59, %c0_60] : memref<3x128xf32, #tpu.memory_space<vmem>>, vector<1x128xf32>
    %176 = vector.extract_strided_slice %171 {offsets = [0, 0], sizes = [8, 32], strides = [1, 1]} : vector<8x128xf32> to vector<8x32xf32>
    %177 = arith.truncf %176 : vector<8x32xf32> to vector<8x32xbf16>
    %cst_61 = arith.constant dense<0.000000e+00> : vector<8x384xf32>
    %178 = tpu.matmul %177, %174, %cst_61 {dimension_numbers = #tpu.dot_dimension_numbers<[1], [0], [0], [1], [0, 0, 1, 1], [], []>} : vector<8x32xbf16>, vector<32x384xbf16>, vector<8x384xf32> -> vector<8x384xf32>
    %179 = vector.extract_strided_slice %172 {offsets = [0, 0], sizes = [8, 128], strides = [1, 1]} : vector<8x384xf32> to vector<8x128xf32>
    %180 = vector.extract_strided_slice %178 {offsets = [0, 0], sizes = [8, 128], strides = [1, 1]} : vector<8x384xf32> to vector<8x128xf32>
    %181 = arith.addf %179, %180 : vector<8x128xf32>
    %182 = arith.negf %181 : vector<8x128xf32>
    %183 = math.exp %182 : vector<8x128xf32>
    %cst_62 = arith.constant 1.000000e+00 : f32
    %184 = vector.broadcast %cst_62 : f32 to vector<8x128xf32>
    %185 = arith.addf %184, %183 : vector<8x128xf32>
    %186 = arith.divf %184, %185 : vector<8x128xf32>
    %187 = vector.extract_strided_slice %172 {offsets = [0, 128], sizes = [8, 128], strides = [1, 1]} : vector<8x384xf32> to vector<8x128xf32>
    %188 = vector.extract_strided_slice %178 {offsets = [0, 128], sizes = [8, 128], strides = [1, 1]} : vector<8x384xf32> to vector<8x128xf32>
    %189 = arith.addf %187, %188 : vector<8x128xf32>
    %190 = arith.negf %189 : vector<8x128xf32>
    %191 = math.exp %190 : vector<8x128xf32>
    %cst_63 = arith.constant 1.000000e+00 : f32
    %192 = vector.broadcast %cst_63 : f32 to vector<8x128xf32>
    %193 = arith.addf %192, %191 : vector<8x128xf32>
    %194 = arith.divf %192, %193 : vector<8x128xf32>
    %195 = vector.extract_strided_slice %172 {offsets = [0, 256], sizes = [8, 128], strides = [1, 1]} : vector<8x384xf32> to vector<8x128xf32>
    %196 = vector.extract_strided_slice %178 {offsets = [0, 256], sizes = [8, 128], strides = [1, 1]} : vector<8x384xf32> to vector<8x128xf32>
    %197 = vector.broadcast %175 : vector<1x128xf32> to vector<8x128xf32>
    %198 = arith.addf %196, %197 : vector<8x128xf32>
    %199 = arith.mulf %186, %198 : vector<8x128xf32>
    %200 = arith.addf %195, %199 : vector<8x128xf32>
    %201 = math.tanh %200 : vector<8x128xf32>
    %cst_64 = arith.constant 1.000000e+00 : f32
    %202 = vector.broadcast %cst_64 : f32 to vector<8x128xf32>
    %203 = arith.subf %202, %194 : vector<8x128xf32>
    %204 = arith.mulf %203, %201 : vector<8x128xf32>
    %205 = arith.mulf %194, %171 : vector<8x128xf32>
    %206 = arith.addf %204, %205 : vector<8x128xf32>
    %207 = vector.extract_strided_slice %171 {offsets = [0, 0], sizes = [8, 32], strides = [1, 1]} : vector<8x128xf32> to vector<8x32xf32>
    %208 = arith.truncf %207 : vector<8x32xf32> to vector<8x32xbf16>
    %c0_65 = arith.constant 0 : index
    %c0_66 = arith.constant 0 : index
    %c0_67 = arith.constant 0 : index
    %209 = vector.load %arg9[%c0_65, %c0_66, %c0_67] : memref<2x32x128xbf16, #tpu.memory_space<vmem>>, vector<1x32x128xbf16>
    %210 = vector.shape_cast %209 : vector<1x32x128xbf16> to vector<32x128xbf16>
    %cst_68 = arith.constant dense<0.000000e+00> : vector<8x128xf32>
    %211 = tpu.matmul %208, %210, %cst_68 {dimension_numbers = #tpu.dot_dimension_numbers<[1], [0], [0], [1], [0, 0, 1, 1], [], []>} : vector<8x32xbf16>, vector<32x128xbf16>, vector<8x128xf32> -> vector<8x128xf32>
    %212 = vector.extract_strided_slice %206 {offsets = [0, 0], sizes = [8, 32], strides = [1, 1]} : vector<8x128xf32> to vector<8x32xf32>
    %213 = arith.truncf %212 : vector<8x32xf32> to vector<8x32xbf16>
    %c1_69 = arith.constant 1 : index
    %c0_70 = arith.constant 0 : index
    %c0_71 = arith.constant 0 : index
    %214 = vector.load %arg9[%c1_69, %c0_70, %c0_71] : memref<2x32x128xbf16, #tpu.memory_space<vmem>>, vector<1x32x128xbf16>
    %215 = vector.shape_cast %214 : vector<1x32x128xbf16> to vector<32x128xbf16>
    %cst_72 = arith.constant dense<0.000000e+00> : vector<8x128xf32>
    %216 = tpu.matmul %213, %215, %cst_72 {dimension_numbers = #tpu.dot_dimension_numbers<[1], [0], [0], [1], [0, 0, 1, 1], [], []>} : vector<8x32xbf16>, vector<32x128xbf16>, vector<8x128xf32> -> vector<8x128xf32>
    %217 = arith.addf %211, %216 : vector<8x128xf32>
    %c0_73 = arith.constant 0 : index
    %c0_74 = arith.constant 0 : index
    %218 = vector.load %arg10[%c0_73, %c0_74] : memref<1x128xf32, #tpu.memory_space<vmem>>, vector<1x128xf32>
    %219 = vector.broadcast %218 : vector<1x128xf32> to vector<8x128xf32>
    %220 = arith.addf %217, %219 : vector<8x128xf32>
    %c0_75 = arith.constant 0 : index
    %c0_76 = arith.constant 0 : index
    %221 = vector.load %arg11[%c0_75, %c0_76] : memref<8x128xf32, #tpu.memory_space<vmem>>, vector<8x128xf32>
    tpu.vector_store %arg11[%c0_75, %c0_76], %220 {strides = array<i32>} : memref<8x128xf32, #tpu.memory_space<vmem>>, vector<8x128xf32>,
    return
  }
  func.func @transform_0(%arg0: i32) -> (i32, i32) {
    %c0_i32 = arith.constant 0 : i32
    %c0_i32_0 = arith.constant 0 : i32
    return %arg0, %c0_i32 : i32, i32
  }
  func.func @transform_1(%arg0: i32) -> (i32, i32) {
    %c0_i32 = arith.constant 0 : i32
    %c0_i32_0 = arith.constant 0 : i32
    %c0_i32_1 = arith.constant 0 : i32
    return %c0_i32, %c0_i32_0 : i32, i32
  }
  func.func @transform_2(%arg0: i32) -> (i32, i32) {
    %c0_i32 = arith.constant 0 : i32
    %c0_i32_0 = arith.constant 0 : i32
    %c0_i32_1 = arith.constant 0 : i32
    return %c0_i32, %c0_i32_0 : i32, i32
  }
  func.func @transform_3(%arg0: i32) -> (i32, i32) {
    %c0_i32 = arith.constant 0 : i32
    %c0_i32_0 = arith.constant 0 : i32
    %c0_i32_1 = arith.constant 0 : i32
    return %c0_i32, %c0_i32_0 : i32, i32
  }
  func.func @transform_4(%arg0: i32) -> (i32, i32, i32) {
    %c0_i32 = arith.constant 0 : i32
    %c0_i32_0 = arith.constant 0 : i32
    %c0_i32_1 = arith.constant 0 : i32
    %c0_i32_2 = arith.constant 0 : i32
    return %c0_i32, %c0_i32_0, %c0_i32_1 : i32, i32, i32
  }
  func.func @transform_5(%arg0: i32) -> (i32, i32, i32) {
    %c0_i32 = arith.constant 0 : i32
    %c0_i32_0 = arith.constant 0 : i32
    %c0_i32_1 = arith.constant 0 : i32
    %c0_i32_2 = arith.constant 0 : i32
    return %c0_i32, %c0_i32_0, %c0_i32_1 : i32, i32, i32
  }
  func.func @transform_6(%arg0: i32) -> (i32, i32) {
    %c0_i32 = arith.constant 0 : i32
    %c0_i32_0 = arith.constant 0 : i32
    %c0_i32_1 = arith.constant 0 : i32
    return %c0_i32, %c0_i32_0 : i32, i32
  }
  func.func @transform_7(%arg0: i32) -> (i32, i32) {
    %c0_i32 = arith.constant 0 : i32
    %c0_i32_0 = arith.constant 0 : i32
    %c0_i32_1 = arith.constant 0 : i32
    return %c0_i32, %c0_i32_0 : i32, i32
  }
  func.func @transform_8(%arg0: i32) -> (i32, i32, i32) {
    %c0_i32 = arith.constant 0 : i32
    %c0_i32_0 = arith.constant 0 : i32
    %c0_i32_1 = arith.constant 0 : i32
    %c0_i32_2 = arith.constant 0 : i32
    return %c0_i32, %c0_i32_0, %c0_i32_1 : i32, i32, i32
  }
  func.func @transform_9(%arg0: i32) -> (i32, i32) {
    %c0_i32 = arith.constant 0 : i32
    %c0_i32_0 = arith.constant 0 : i32
    %c0_i32_1 = arith.constant 0 : i32
    return %c0_i32, %c0_i32_0 : i32, i32
  }
  func.func @transform_10(%arg0: i32) -> (i32, i32) {
    %c0_i32 = arith.constant 0 : i32
    %c0_i32_0 = arith.constant 0 : i32
    return %arg0, %c0_i32 : i32, i32
  }
}

</mosaic_0001>

<bundles_post_ra>
// kernel: mouse_forward.1
= control target key start
LH: loop header
LB: loop body
LE: loop exit
PB: predicated region body
PF: predicated region fallthrough
CT: control target
= control target key end

     0   :  { %v3255_v1 = vmov 0   ;;  %vm186_vm0 = vcmask 392192   ;;  %vm999_vm1 = vcmask 1041409   ;;  %vm1001_vm2 = vcmask 1042434   ;;  %s4162_s1 = inlined_call_operand.vmem [shape: bf16[48,512], index: 1, kind: input, shape index: {}]   ;;  %s4163_s0 = inlined_call_operand.vmem [shape: bf16[128,48], index: 0, kind: input, shape index: {}]   ;;  %s4164_s3 = inlined_call_operand.vmem [shape: bf16[512,384], index: 3, kind: input, shape index: {}]   ;;  %s4165_s2 = inlined_call_operand.vmem [shape: f32[1,512], index: 2, kind: input, shape index: {}]   ;;  %s4166_s5 = inlined_call_operand.vmem [shape: bf16[3,32,384], index: 5, kind: input, shape index: {}]   ;;  %s4167_s6 = inlined_call_operand.vmem [shape: f32[3,384], index: 6, kind: input, shape index: {}]   ;;  %s4168_s7 = inlined_call_operand.vmem [shape: f32[3,128], index: 7, kind: input, shape index: {}]   ;;  %s4169_s4 = inlined_call_operand.vmem [shape: bf16[2,32,384], index: 4, kind: input, shape index: {}]   ;;  %s4170_s8 = inlined_call_operand.vmem [shape: bf16[2,32,128], index: 8, kind: input, shape index: {}]   ;;  %s4171_s9 = inlined_call_operand.vmem [shape: f32[1,128], index: 9, kind: input, shape index: {}]   ;;  %s4172_s10 = inlined_call_operand.vmem [shape: f32[8,128], index: 10, kind: output, shape index: {}]  }
   0x1   :  { %v2997_v0 = vld [vmem:[%s4162_s1 + $0x44] ss:$16 sps:$4 sm:$0xff]   ;;  %243 = vmatprep.mubr.bf16.mxu0 %v3255_v1  ;;  %356 = vmatprep.mubr.bf16.mxu1 %v3255_v1  ;;  %v2999_v2 = vld [vmem:[%s4162_s1 + $0x4c] ss:$16 sps:$4 sm:$0xff]   ;;  %v3001_v3 = vld [vmem:[%s4162_s1 + $0x40] ss:$16 sps:$4 sm:$0xff]  }
   0x2   :  { %221 = vmatprep.subr.bf16.mxu0 %v2997_v0  ;;  %v3002_v4 = vld [vmem:[%s4162_s1 + $0x48] ss:$16 sps:$4 sm:$0xff]   ;;  %334 = vmatprep.subr.bf16.mxu1 %v2999_v2  ;;  %v3003_v5 = vld [vmem:[%s4162_s1 + $0x24] ss:$16 sps:$4 sm:$0xff]   ;;  %v3005_v6 = vld [vmem:[%s4162_s1 + $0x2c] ss:$16 sps:$4 sm:$0xff]  }
   0x3   :  { %222 = vmatpush1.bf16.msra.mxu0 %v3001_v3  ;;  %335 = vmatpush1.bf16.msra.mxu1 %v3002_v4  ;;  %v3007_v7 = vld [vmem:[%s4162_s1 + $0x20] ss:$16 sps:$4 sm:$0xff]   ;;  %v3008_v8 = vld [vmem:[%s4162_s1 + $0x28] ss:$16 sps:$4 sm:$0xff]   ;;  %v3009_v9 = vld [vmem:[%s4162_s1 + $0x4] ss:$16 sps:$4 sm:$0xff]  }
   0x4   :  { %223 = vmatprep.subr.bf16.mxu0 %v3003_v5  ;;  %336 = vmatprep.subr.bf16.mxu1 %v3005_v6  ;;  %v3011_v10 = vld [vmem:[%s4162_s1 + $0xc] ss:$16 sps:$4 sm:$0xff]   ;;  %v3013_v11 = vld [vmem:[%s4162_s1] ss:$16 sps:$4 sm:$0xff]   ;;  %v3014_v12 = vld [vmem:[%s4162_s1 + $0x8] ss:$16 sps:$4 sm:$0xff]  }
   0x5   :  { %v3015_v13 = vld [vmem:[%s4163_s0] sm:$0xff]   ;;  %v3016_v14 = vld [vmem:[%s4163_s0 + $0x8] sm:$0xff]   ;;  %v3017_v15 = vld [vmem:[%s4163_s0 + $0x10] sm:$0xff]   ;;  %vm1003_vm3 = vcmask 1043459   ;;  %vm1005_vm4 = vcmask 1044484   ;;  %vm1007_vm5 = vcmask 1045509  }
   0x6   :  { %v3018_v16 = vld [vmem:[%s4163_s0 + $0x18] sm:$0xff]   ;;  %v3019_v17 = vld [vmem:[%s4163_s0 + $0x20] sm:$0xff]   ;;  %v3020_v18 = vld [vmem:[%s4163_s0 + $0x28] sm:$0xff]   ;;  %vm1009_vm6 = vcmask 1046534   ;;  %vm1011_vm7 = vcmask 1047559   ;;  %vm3257_vm8 = vmmov 0  }
   0x7   :  { %224 = vmatpush1.bf16.msra.mxu0 %v3007_v7  ;;  %337 = vmatpush1.bf16.msra.mxu1 %v3008_v8  ;;  %v3021_v19 = vld [vmem:[%s4163_s0 + $0x30] sm:$0xff]   ;;  %v3022_v20 = vld [vmem:[%s4163_s0 + $0x38] sm:$0xff]   ;;  %v3041_v35 = vld [vmem:[%s4164_s3 + $0x60] ss:$12 sps:$4 sm:$0xff]   ;;  %v66_v8 = vlaneseq  ;;  %vm1779_vm9 = vcmask 261120  }
   0x8   :  { %225 = vmatprep.subr.bf16.mxu0 %v3009_v9  ;;  %338 = vmatprep.subr.bf16.mxu1 %v3011_v10  ;;  %v3025_v21 = vld [vmem:[%s4164_s3 + $0xac] ss:$12 sps:$4 sm:$0xff]   ;;  %v3023_v22 = vld [vmem:[%s4164_s3 + $0xa8] ss:$12 sps:$4 sm:$0xff]   ;;  %v3029_v27 = vld [vmem:[%s4164_s3 + $0x90] ss:$12 sps:$4 sm:$0xff]  }
   0x9   :  { %v3026_v23 = vld [vmem:[%s4164_s3 + $0x228] ss:$12 sps:$4 sm:$0xff]   ;;  %v3028_v24 = vld [vmem:[%s4164_s3 + $0x22c] ss:$12 sps:$4 sm:$0xff]   ;;  %v3032_v28 = vld [vmem:[%s4164_s3 + $0x210] ss:$12 sps:$4 sm:$0xff]  }
   0xa   :  { %v3031_v25 = vld [vmem:[%s4164_s3 + $0x94] ss:$12 sps:$4 sm:$0xff]   ;;  %v3037_v29 = vld [vmem:[%s4164_s3 + $0x7c] ss:$12 sps:$4 sm:$0xff]   ;;  %v3035_v31 = vld [vmem:[%s4164_s3 + $0x78] ss:$12 sps:$4 sm:$0xff]  }
   0xb   :  { %226 = vmatpush1.bf16.msra.mxu0 %v3013_v11  ;;  %339 = vmatpush1.bf16.msra.mxu1 %v3014_v12  ;;  %v3034_v26 = vld [vmem:[%s4164_s3 + $0x214] ss:$12 sps:$4 sm:$0xff]   ;;  %v3040_v30 = vld [vmem:[%s4164_s3 + $0x1fc] ss:$12 sps:$4 sm:$0xff]   ;;  %v3038_v32 = vld [vmem:[%s4164_s3 + $0x1f8] ss:$12 sps:$4 sm:$0xff]  }
   0xc   :  { %1554 = vmatprep.subr.bf16.mxu0 %v3025_v21  ;;  %1595 = vmatprep.subr.bf16.mxu1 %v3028_v24  ;;  %v3043_v33 = vld [vmem:[%s4164_s3 + $0x64] ss:$12 sps:$4 sm:$0xff]   ;;  %v3044_v36 = vld [vmem:[%s4164_s3 + $0x1e0] ss:$12 sps:$4 sm:$0xff]   ;;  %v3047_v39 = vld [vmem:[%s4164_s3 + $0x48] ss:$12 sps:$4 sm:$0xff]  }
   0xd   :  { %v3046_v34 = vld [vmem:[%s4164_s3 + $0x1e4] ss:$12 sps:$4 sm:$0xff]   ;;  %v3049_v37 = vld [vmem:[%s4164_s3 + $0x4c] ss:$12 sps:$4 sm:$0xff]   ;;  %v3050_v40 = vld [vmem:[%s4164_s3 + $0x1c8] ss:$12 sps:$4 sm:$0xff]  }
   0xe   :  { %2669 = vmatmul.mubr.msk.bf16.vlgmr.msra.gmra.mxu0 %vm186_vm0, %v3015_v13  ;;  %2677 = vmatmul.mubr.msk.bf16.vlgmr.msra.gmra.mxu1 %vm186_vm0, %v3015_v13  ;;  %v3052_v38 = vld [vmem:[%s4164_s3 + $0x1cc] ss:$12 sps:$4 sm:$0xff]   ;;  %v3055_v41 = vld [vmem:[%s4164_s3 + $0x34] ss:$12 sps:$4 sm:$0xff]   ;;  %v3053_v43 = vld [vmem:[%s4164_s3 + $0x30] ss:$12 sps:$4 sm:$0xff]  }
   0xf   :  { %253 = vmatprep.mubr.bf16.mxu0 %v3255_v1  ;;  %366 = vmatprep.mubr.bf16.mxu1 %v3255_v1  ;;  %v3058_v42 = vld [vmem:[%s4164_s3 + $0x1b4] ss:$12 sps:$4 sm:$0xff]   ;;  %v3056_v44 = vld [vmem:[%s4164_s3 + $0x1b0] ss:$12 sps:$4 sm:$0xff]   ;;  %v3059_v47 = vld [vmem:[%s4164_s3 + $0x18] ss:$12 sps:$4 sm:$0xff]  }
  0x10   :  { %1555 = vmatpush1.bf16.msra.mxu0 %v3023_v22  ;;  %1596 = vmatpush1.bf16.msra.mxu1 %v3026_v23  ;;  %v3061_v45 = vld [vmem:[%s4164_s3 + $0x1c] ss:$12 sps:$4 sm:$0xff]   ;;  %v3062_v48 = vld [vmem:[%s4164_s3 + $0x198] ss:$12 sps:$4 sm:$0xff]   ;;  %v3065_v51 = vld [vmem:[%s4164_s3] ss:$12 sps:$4 sm:$0xff]  }
  0x11   :  { %1556 = vmatprep.subr.bf16.mxu0 %v3031_v25  ;;  %1597 = vmatprep.subr.bf16.mxu1 %v3034_v26  ;;  %v3064_v46 = vld [vmem:[%s4164_s3 + $0x19c] ss:$12 sps:$4 sm:$0xff]   ;;  %v3067_v49 = vld [vmem:[%s4164_s3 + $0x4] ss:$12 sps:$4 sm:$0xff]   ;;  %v3068_v52 = vld [vmem:[%s4164_s3 + $0x180] ss:$12 sps:$4 sm:$0xff]  }
  0x12   :  { %v3070_v50 = vld [vmem:[%s4164_s3 + $0x184] ss:$12 sps:$4 sm:$0xff]   ;;  %v3073_v53 = vld [vmem:[%s4164_s3 + $0x16c] ss:$12 sps:$4 sm:$0xff]   ;;  %v3071_v55 = vld [vmem:[%s4164_s3 + $0x168] ss:$12 sps:$4 sm:$0xff]  }
  0x13   :  { %v3076_v54 = vld [vmem:[%s4164_s3 + $0x2ec] ss:$12 sps:$4 sm:$0xff]   ;;  %v3074_v56 = vld [vmem:[%s4164_s3 + $0x2e8] ss:$12 sps:$4 sm:$0xff]   ;;  %v3077_v59 = vld [vmem:[%s4164_s3 + $0x150] ss:$12 sps:$4 sm:$0xff]  }
  0x14   :  { %1557 = vmatpush1.bf16.msra.mxu0 %v3029_v27  ;;  %1598 = vmatpush1.bf16.msra.mxu1 %v3032_v28  ;;  %v3079_v57 = vld [vmem:[%s4164_s3 + $0x154] ss:$12 sps:$4 sm:$0xff]   ;;  %v3080_v60 = vld [vmem:[%s4164_s3 + $0x2d0] ss:$12 sps:$4 sm:$0xff]   ;;  %v3083_v63 = vld [vmem:[%s4164_s3 + $0x138] ss:$12 sps:$4 sm:$0xff]  }
  0x15   :  { %1558 = vmatprep.subr.bf16.mxu0 %v3037_v29  ;;  %1599 = vmatprep.subr.bf16.mxu1 %v3040_v30  ;;  %v3082_v58 = vld [vmem:[%s4164_s3 + $0x2d4] ss:$12 sps:$4 sm:$0xff]   ;;  %v3085_v61 = vld [vmem:[%s4164_s3 + $0x13c] ss:$12 sps:$4 sm:$0xff]   ;;  %v3086_v0 = vld [vmem:[%s4164_s3 + $0x2b8] ss:$12 sps:$4 sm:$0xff]  }
  0x16   :  { %2670 = vmatmul.mubr.msk.bf16.gmra.mxu0 %vm186_vm0, %v3016_v14  ;;  %2678 = vmatmul.mubr.msk.bf16.gmra.mxu1 %vm186_vm0, %v3016_v14  ;;  %v3088_v62 = vld [vmem:[%s4164_s3 + $0x2bc] ss:$12 sps:$4 sm:$0xff]   ;;  %v3091_v2 = vld [vmem:[%s4164_s3 + $0x124] ss:$12 sps:$4 sm:$0xff]   ;;  %v3089_v4 = vld [vmem:[%s4164_s3 + $0x120] ss:$12 sps:$4 sm:$0xff]  }
  0x17   :  { %263 = vmatprep.mubr.bf16.mxu0 %v3255_v1  ;;  %376 = vmatprep.mubr.bf16.mxu1 %v3255_v1  ;;  %v3094_v3 = vld [vmem:[%s4164_s3 + $0x2a4] ss:$12 sps:$4 sm:$0xff]   ;;  %v3092_v5 = vld [vmem:[%s4164_s3 + $0x2a0] ss:$12 sps:$4 sm:$0xff]   ;;  %v3095_v9 = vld [vmem:[%s4164_s3 + $0x108] ss:$12 sps:$4 sm:$0xff]  }
  0x18   :  { %1559 = vmatpush1.bf16.msra.mxu0 %v3035_v31  ;;  %1600 = vmatpush1.bf16.msra.mxu1 %v3038_v32  ;;  %v3097_v6 = vld [vmem:[%s4164_s3 + $0x10c] ss:$12 sps:$4 sm:$0xff]   ;;  %v3098_v10 = vld [vmem:[%s4164_s3 + $0x288] ss:$12 sps:$4 sm:$0xff]   ;;  %v67_v13 = vshrl.u32 %v66_v8, 7 }
  0x19   :  { %1560 = vmatprep.subr.bf16.mxu0 %v3043_v33  ;;  %1601 = vmatprep.subr.bf16.mxu1 %v3046_v34  ;;  %v3100_v7 = vld [vmem:[%s4164_s3 + $0x28c] ss:$12 sps:$4 sm:$0xff]   ;;  %v3103_v11 = vld [vmem:[%s4164_s3 + $0xf4] ss:$12 sps:$4 sm:$0xff]   ;;  %v3101_v14 = vld [vmem:[%s4164_s3 + $0xf0] ss:$12 sps:$4 sm:$0xff]  }
  0x1a   :  { %v3106_v12 = vld [vmem:[%s4164_s3 + $0x274] ss:$12 sps:$4 sm:$0xff]   ;;  %v3110_v21 = vld [vmem:[%s4164_s3 + $0x258] ss:$12 sps:$4 sm:$0xff]   ;;  %v3592_v23 = vsub.s32 1, %v67_v13  ;;  %v80_v24 = vsub.s32 3, %v67_v13 }
  0x1b   :  { %v64_v22 = vld [vmem:[%s4165_s2] sm:$0xf]  ;;  %v3115_v26 = vld [vmem:[%s4164_s3 + $0xc4] ss:$12 sps:$4 sm:$0xff]  }
  0x1c   :  { %1561 = vmatpush1.bf16.msra.mxu0 %v3041_v35  ;;  %1602 = vmatpush1.bf16.msra.mxu1 %v3044_v36  ;;  %v3113_v25 = vld [vmem:[%s4164_s3 + $0xc0] ss:$12 sps:$4 sm:$0xff]   ;;  %v3118_v28 = vld [vmem:[%s4164_s3 + $0x244] ss:$12 sps:$4 sm:$0xff]   ;;  %v3613_v33 = vrot.slane %v64_v22, %v3592_v23  ;;  %v3615_v34 = vrot.slane %v64_v22, %v80_v24 }
  0x1d   :  { %1562 = vmatprep.subr.bf16.mxu0 %v3049_v37  ;;  %1603 = vmatprep.subr.bf16.mxu1 %v3052_v38  ;;  %v3116_v27 = vld [vmem:[%s4164_s3 + $0x240] ss:$12 sps:$4 sm:$0xff]  }
  0x1e   :  { %2671 = vmatmul.mubr.msk.bf16.gmra.mxu0 %vm186_vm0, %v3017_v15  ;;  %2679 = vmatmul.mubr.msk.bf16.gmra.mxu1 %vm186_vm0, %v3017_v15  ;;  %v3104_v15 = vld [vmem:[%s4164_s3 + $0x270] ss:$12 sps:$4 sm:$0xff]  }
  0x1f   :  { %273 = vmatprep.mubr.bf16.mxu0 %v3255_v1  ;;  %386 = vmatprep.mubr.bf16.mxu1 %v3255_v1 }
  0x20   :  { %1563 = vmatpush1.bf16.msra.mxu0 %v3047_v39  ;;  %1604 = vmatpush1.bf16.msra.mxu1 %v3050_v40  ;;  %v3119_v39 = vld [vmem:[%s4164_s3 + $0x170] ss:$12 sps:$4 sm:$0xff]  }
  0x21   :  { %1564 = vmatprep.subr.bf16.mxu0 %v3055_v41  ;;  %1605 = vmatprep.subr.bf16.mxu1 %v3058_v42  ;;  %v3120_v40 = vld [vmem:[%s4164_s3 + $0x2f0] ss:$12 sps:$4 sm:$0xff]  }
  0x24   :  { %1565 = vmatpush1.bf16.msra.mxu0 %v3053_v43  ;;  %1606 = vmatpush1.bf16.msra.mxu1 %v3056_v44 }
  0x25   :  { %1566 = vmatprep.subr.bf16.mxu0 %v3061_v45  ;;  %1607 = vmatprep.subr.bf16.mxu1 %v3064_v46 }
  0x26   :  { %2672 = vmatmul.mubr.msk.bf16.gmra.mxu0 %vm186_vm0, %v3018_v16  ;;  %2680 = vmatmul.mubr.msk.bf16.gmra.mxu1 %vm186_vm0, %v3018_v16  ;;  %v3109_v16 = vld [vmem:[%s4164_s3 + $0xdc] ss:$12 sps:$4 sm:$0xff]  }
  0x27   :  { %283 = vmatprep.mubr.bf16.mxu0 %v3255_v1  ;;  %396 = vmatprep.mubr.bf16.mxu1 %v3255_v1 }
  0x28   :  { %1567 = vmatpush1.bf16.msra.mxu0 %v3059_v47  ;;  %1608 = vmatpush1.bf16.msra.mxu1 %v3062_v48 }
  0x29   :  { %1568 = vmatprep.subr.bf16.mxu0 %v3067_v49  ;;  %1609 = vmatprep.subr.bf16.mxu1 %v3070_v50 }
  0x2c   :  { %1569 = vmatpush1.bf16.msra.mxu0 %v3065_v51  ;;  %1610 = vmatpush1.bf16.msra.mxu1 %v3068_v52 }
  0x2d   :  { %1570 = vmatprep.subr.bf16.mxu0 %v3073_v53  ;;  %1611 = vmatprep.subr.bf16.mxu1 %v3076_v54 }
  0x2e   :  { %2673 = vmatmul.mubr.msk.bf16.gmra.mxu0 %vm186_vm0, %v3019_v17  ;;  %2681 = vmatmul.mubr.msk.bf16.gmra.mxu1 %vm186_vm0, %v3019_v17  ;;  %v3112_v17 = vld [vmem:[%s4164_s3 + $0x25c] ss:$12 sps:$4 sm:$0xff]  }
  0x2f   :  { %293 = vmatprep.mubr.bf16.mxu0 %v3255_v1  ;;  %406 = vmatprep.mubr.bf16.mxu1 %v3255_v1 }
  0x30   :  { %1571 = vmatpush2.bf16.msra.mxu0 %v3071_v55  ;;  %1612 = vmatpush2.bf16.msra.mxu1 %v3074_v56 }
  0x31   :  { %1572 = vmatprep.subr.bf16.mxu0 %v3079_v57  ;;  %1613 = vmatprep.subr.bf16.mxu1 %v3082_v58 }
  0x34   :  { %1573 = vmatpush2.bf16.msra.mxu0 %v3077_v59  ;;  %1614 = vmatpush2.bf16.msra.mxu1 %v3080_v60 }
  0x35   :  { %1574 = vmatprep.subr.bf16.mxu0 %v3085_v61  ;;  %1615 = vmatprep.subr.bf16.mxu1 %v3088_v62 }
  0x36   :  { %2674 = vmatmul.mubr.msk.bf16.gmra.mxu0 %vm186_vm0, %v3020_v18  ;;  %2682 = vmatmul.mubr.msk.bf16.gmra.mxu1 %vm186_vm0, %v3020_v18  ;;  %v3579_v18 = vsub.s32 0, %v67_v13 }
  0x37   :  { %303 = vmatprep.mubr.bf16.mxu0 %v3255_v1  ;;  %416 = vmatprep.mubr.bf16.mxu1 %v3255_v1 }
  0x38   :  { %1575 = vmatpush2.bf16.msra.mxu0 %v3083_v63  ;;  %1616 = vmatpush2.bf16.msra.mxu1 %v3086_v0  ;;  %v3607_v29 = vrot.slane %v64_v22, %v3579_v18 }
  0x39   :  { %1576 = vmatprep.subr.bf16.mxu0 %v3091_v2  ;;  %1617 = vmatprep.subr.bf16.mxu1 %v3094_v3 }
  0x3c   :  { %1577 = vmatpush2.bf16.msra.mxu0 %v3089_v4  ;;  %1618 = vmatpush2.bf16.msra.mxu1 %v3092_v5 }
  0x3d   :  { %1578 = vmatprep.subr.bf16.mxu0 %v3097_v6  ;;  %1619 = vmatprep.subr.bf16.mxu1 %v3100_v7 }
  0x3e   :  { %2675 = vmatmul.mubr.msk.bf16.gmra.mxu0 %vm186_vm0, %v3021_v19  ;;  %2683 = vmatmul.mubr.msk.bf16.gmra.mxu1 %vm186_vm0, %v3021_v19  ;;  %v3581_v19 = vsub.s32 2, %v67_v13 }
  0x3f   :  { %313 = vmatprep.mubr.bf16.mxu0 %v3255_v1  ;;  %426 = vmatprep.mubr.bf16.mxu1 %v3255_v1 }
  0x40   :  { %1579 = vmatpush2.bf16.msra.mxu0 %v3095_v9  ;;  %1620 = vmatpush2.bf16.msra.mxu1 %v3098_v10  ;;  %v3610_v30 = vrot.slane %v64_v22, %v3581_v19 }
  0x41   :  { %1580 = vmatprep.subr.bf16.mxu0 %v3103_v11  ;;  %1621 = vmatprep.subr.bf16.mxu1 %v3106_v12 }
  0x44   :  { %1581 = vmatpush2.bf16.msra.mxu0 %v3101_v14  ;;  %1622 = vmatpush2.bf16.msra.mxu1 %v3104_v15 }
  0x45   :  { %1582 = vmatprep.subr.bf16.mxu0 %v3109_v16  ;;  %1623 = vmatprep.subr.bf16.mxu1 %v3112_v17 }
  0x46   :  { %2676 = vmatmul.mubr.msk.bf16.gmra.mxu0 %vm186_vm0, %v3022_v20  ;;  %2684 = vmatmul.mubr.msk.bf16.gmra.mxu1 %vm186_vm0, %v3022_v20  ;;  %v3107_v20 = vld [vmem:[%s4164_s3 + $0xd8] ss:$12 sps:$4 sm:$0xff]  }
  0x48   :  { %1583 = vmatpush2.bf16.msra.mxu0 %v3107_v20  ;;  %1624 = vmatpush2.bf16.msra.mxu1 %v3110_v21 }
  0x49   :  { %1584 = vmatprep.subr.bf16.mxu0 %v3115_v26  ;;  %1625 = vmatprep.subr.bf16.mxu1 %v3118_v28 }
  0x4c   :  { %1585 = vmatpush2.bf16.msra.mxu0 %v3113_v25  ;;  %1626 = vmatpush2.bf16.msra.mxu1 %v3116_v27 }
  0x4d   :  { %2873 = vmatprep.subr.bf16.mxu0 %v3119_v39  ;;  %2895 = vmatprep.subr.bf16.mxu1 %v3120_v40 }
  0xce   :  { %v245_v31 = vpop.f32.mrf.mxu0  ;;  %v358_v32 = vpop.f32.mrf.mxu1 }
  0xcf   :  { %v246_v35 = vadd.f32 %v245_v31, %v3607_v29  ;;  %v359_v36 = vadd.f32 %v358_v32, %v3610_v30 }
  0xd0   :  { %v247_v37 = vpop.f32.mrf.mxu0  ;;  %v360_v38 = vpop.f32.mrf.mxu1 }
  0xd1   :  { %v248_v41 = vadd.f32 %v247_v37, %v3613_v33  ;;  %v361_v42 = vadd.f32 %v360_v38, %v3615_v34  ;;  %v437_v47 = vmax.f32 %v246_v35, 0.0  ;;  %v439_v48 = vmax.f32 %v359_v36, 0.0 }
  0xd2   :  { %v249_v43 = vpop.f32.mrf.mxu0  ;;  %v362_v44 = vpop.f32.mrf.mxu1 }
  0xd3   :  { %v250_v45 = vadd.f32 %v249_v43, %v3607_v29  ;;  %v363_v46 = vadd.f32 %v362_v44, %v3610_v30  ;;  %v438_v55 = vmax.f32 %v248_v41, 0.0  ;;  %v440_v56 = vmax.f32 %v361_v42, 0.0 }
  0xd4   :  { %v251_v49 = vpop.f32.mrf.mxu0  ;;  %v364_v50 = vpop.f32.mrf.mxu1 }
  0xd5   :  { %v441_v51 = vmax.f32 %v250_v45, 0.0  ;;  %v443_v52 = vmax.f32 %v363_v46, 0.0  ;;  %v252_v53 = vadd.f32 %v251_v49, %v3613_v33  ;;  %v365_v54 = vadd.f32 %v364_v50, %v3615_v34 }
  0xd6   :  { %v255_v57 = vpop.f32.mrf.mxu0  ;;  %v368_v58 = vpop.f32.mrf.mxu1 }
  0xd7   :  { %v501_v59 = vadd.f32 %v441_v51, %v437_v47  ;;  %v515_v60 = vadd.f32 %v443_v52, %v439_v48  ;;  %v442_v61 = vmax.f32 %v252_v53, 0.0  ;;  %v444_v62 = vmax.f32 %v365_v54, 0.0 }
  0xd8   :  { %v256_v63 = vadd.f32 %v255_v57, %v3607_v29  ;;  %v369_v0 = vadd.f32 %v368_v58, %v3610_v30  ;;  %v257_v2 = vpop.f32.mrf.mxu0  ;;  %v370_v3 = vpop.f32.mrf.mxu1 }
  0xd9   :  { %v502_v4 = vrot.slane %v501_v59, 4  ;;  %v516_v5 = vrot.slane %v515_v60, 4  ;;  %v508_v6 = vadd.f32 %v442_v61, %v438_v55  ;;  %v522_v7 = vadd.f32 %v444_v62, %v440_v56 }
  0xda   :  { %v445_v8 = vmax.f32 %v256_v63, 0.0  ;;  %v447_v9 = vmax.f32 %v369_v0, 0.0  ;;  %v258_v10 = vadd.f32 %v257_v2, %v3613_v33  ;;  %v371_v11 = vadd.f32 %v370_v3, %v3615_v34  ;;  %v259_v12 = vpop.f32.mrf.mxu0  ;;  %v372_v13 = vpop.f32.mrf.mxu1 }
  0xdb   :  { %v503_v14 = vadd.f32 %v502_v4, %v501_v59  ;;  %v517_v15 = vadd.f32 %v516_v5, %v515_v60  ;;  %v509_v16 = vrot.slane %v508_v6, 4  ;;  %v523_v17 = vrot.slane %v522_v7, 4 }
  0xdc   :  { %v446_v20 = vmax.f32 %v258_v10, 0.0  ;;  %v448_v21 = vmax.f32 %v371_v11, 0.0  ;;  %v260_v22 = vadd.f32 %v259_v12, %v3607_v29  ;;  %v373_v24 = vadd.f32 %v372_v13, %v3610_v30  ;;  %v261_v25 = vpop.f32.mrf.mxu0  ;;  %v374_v26 = vpop.f32.mrf.mxu1 }
  0xdd   :  { %v504_v27 = vrot.slane %v503_v14, 2  ;;  %v518_v28 = vrot.slane %v517_v15, 2  ;;  %v510_v31 = vadd.f32 %v509_v16, %v508_v6  ;;  %v524_v32 = vadd.f32 %v523_v17, %v522_v7 }
  0xde   :  { %v449_v35 = vmax.f32 %v260_v22, 0.0  ;;  %v451_v36 = vmax.f32 %v373_v24, 0.0  ;;  %v262_v37 = vadd.f32 %v261_v25, %v3613_v33  ;;  %v375_v38 = vadd.f32 %v374_v26, %v3615_v34  ;;  %v265_v39 = vpop.f32.mrf.mxu0  ;;  %v378_v40 = vpop.f32.mrf.mxu1 }
  0xdf   :  { %v505_v41 = vadd.f32 %v504_v27, %v503_v14  ;;  %v519_v42 = vadd.f32 %v518_v28, %v517_v15  ;;  %v511_v43 = vrot.slane %v510_v31, 2  ;;  %v525_v44 = vrot.slane %v524_v32, 2 }
  0xe0   :  { %v529_v45 = vadd.f32 %v449_v35, %v445_v8  ;;  %v543_v46 = vadd.f32 %v451_v36, %v447_v9  ;;  %v450_v47 = vmax.f32 %v262_v37, 0.0  ;;  %v452_v48 = vmax.f32 %v375_v38, 0.0  ;;  %v267_v49 = vpop.f32.mrf.mxu0  ;;  %v380_v50 = vpop.f32.mrf.mxu1 }
  0xe1   :  { %v506_v51 = vrot.slane %v505_v41, 1  ;;  %v520_v52 = vrot.slane %v519_v42, 1  ;;  %v512_v53 = vadd.f32 %v511_v43, %v510_v31  ;;  %v526_v54 = vadd.f32 %v525_v44, %v524_v32 }
  0xe2   :  { %v530_v55 = vrot.slane %v529_v45, 4  ;;  %v544_v56 = vrot.slane %v543_v46, 4  ;;  %v536_v57 = vadd.f32 %v450_v47, %v446_v20  ;;  %v550_v58 = vadd.f32 %v452_v48, %v448_v21  ;;  %v269_v59 = vpop.f32.mrf.mxu0  ;;  %v382_v60 = vpop.f32.mrf.mxu1 }
  0xe3   :  { %v507_v61 = vadd.f32 %v506_v51, %v505_v41  ;;  %v521_v62 = vadd.f32 %v520_v52, %v519_v42  ;;  %v513_v63 = vrot.slane %v512_v53, 1  ;;  %v527_v0 = vrot.slane %v526_v54, 1 }
  0xe4   :  { %v531_v2 = vadd.f32 %v530_v55, %v529_v45  ;;  %v545_v3 = vadd.f32 %v544_v56, %v543_v46  ;;  %v537_v4 = vrot.slane %v536_v57, 4  ;;  %v551_v5 = vrot.slane %v550_v58, 4  ;;  %v271_v6 = vpop.f32.mrf.mxu0  ;;  %v384_v7 = vpop.f32.mrf.mxu1 }
  0xe5   :  { %v726_v8 = vmul.f32 0.0625, %v507_v61  ;;  %v728_v9 = vmul.f32 0.0625, %v521_v62  ;;  %v514_v16 = vadd.f32 %v513_v63, %v512_v53  ;;  %v528_v17 = vadd.f32 %v527_v0, %v526_v54 }
  0xe6   :  { %v532_v10 = vrot.slane %v531_v2, 2  ;;  %v546_v11 = vrot.slane %v545_v3, 2  ;;  %v538_v12 = vadd.f32 %v537_v4, %v536_v57  ;;  %v552_v13 = vadd.f32 %v551_v5, %v550_v58  ;;  %v3639_v14 = vpop.f32.mrf.mxu0  ;;  %v3641_v15 = vpop.f32.mrf.mxu1 }
  0xe7   :  { %v758_v25 = vpack.c.bf16 %v726_v8, %v726_v8  ;;  %v760_v26 = vpack.c.bf16 %v728_v9, %v728_v9  ;;  %v727_v37 = vmul.f32 0.0625, %v514_v16  ;;  %v729_v38 = vmul.f32 0.0625, %v528_v17 }
  0xe8   :  { %v533_v20 = vadd.f32 %v532_v10, %v531_v2  ;;  %v547_v21 = vadd.f32 %v546_v11, %v545_v3  ;;  %v539_v22 = vrot.slane %v538_v12, 2  ;;  %v553_v24 = vrot.slane %v552_v13, 2  ;;  %v3643_v27 = vpop.f32.mrf.mxu0  ;;  %v3645_v28 = vpop.f32.mrf.mxu1 }
  0xe9   :  { %v266_v41 = vadd.f32 %v265_v39, %v3607_v29  ;;  %v379_v45 = vadd.f32 %v378_v40, %v3610_v30  ;;  %v3649_v46 = vunpack.c.l.b16 %v758_v25  ;;  %v3651_v47 = vunpack.c.l.b16 %v760_v26 }
  0xea   :  { %v534_v31 = vrot.slane %v533_v20, 1  ;;  %v548_v32 = vrot.slane %v547_v21, 1  ;;  %v540_v35 = vadd.f32 %v539_v22, %v538_v12  ;;  %v554_v36 = vadd.f32 %v553_v24, %v552_v13  ;;  %v279_v48 = vpop.f32.mrf.mxu0  ;;  %v392_v51 = vpop.f32.mrf.mxu1 }
  0xeb   :  { %v268_v54 = vadd.f32 %v267_v49, %v3613_v33  ;;  %v381_v55 = vadd.f32 %v380_v50, %v3615_v34  ;;  %v759_v56 = vpack.c.bf16 %v727_v37, %v727_v37  ;;  %v761_v57 = vpack.c.bf16 %v729_v38, %v729_v38 }
  0xec   :  { %v535_v42 = vadd.f32 %v534_v31, %v533_v20  ;;  %v549_v43 = vadd.f32 %v548_v32, %v547_v21  ;;  %v541_v44 = vrot.slane %v540_v35, 1  ;;  %v555_v53 = vrot.slane %v554_v36, 1  ;;  %v281_v4 = vpop.f32.mrf.mxu0  ;;  %v394_v50 = vpop.f32.mrf.mxu1 }
  0xed   :  { %v270_v39 = vadd.f32 %v269_v59, %v3607_v29  ;;  %v383_v58 = vadd.f32 %v382_v60, %v3610_v30  ;;  %v453_v62 = vmax.f32 %v266_v41, 0.0  ;;  %v455_v63 = vmax.f32 %v379_v45, 0.0 }
  0xee   :  { %v542_v52 = vadd.f32 %v541_v44, %v540_v35  ;;  %v3657_v61 = vmul.f32 0.0625, %v535_v42  ;;  %v3659_v40 = vmul.f32 0.0625, %v549_v43  ;;  %v272_v3 = vadd.f32 %v271_v6, %v3613_v33  ;;  %v3673_v24 = vpop.f32.mrf.mxu0  ;;  %v3675_v25 = vpop.f32.mrf.mxu1 }
  0xef   :  { %v457_v0 = vmax.f32 %v270_v39, 0.0  ;;  %v459_v2 = vmax.f32 %v383_v58, 0.0  ;;  %v385_v49 = vadd.f32 %v384_v7, %v3615_v34  ;;  %v556_v8 = vadd.f32 %v555_v53, %v554_v36 }
  0xf0   :  { %v3663_v5 = vmul.f32 0.0625, %v542_v52  ;;  %v454_v59 = vmax.f32 %v268_v54, 0.0  ;;  %v456_v9 = vmax.f32 %v381_v55, 0.0  ;;  %v458_v11 = vmax.f32 %v272_v3, 0.0 }
  0xf1   :  { %v557_v60 = vadd.f32 %v457_v0, %v453_v62  ;;  %v571_v10 = vadd.f32 %v459_v2, %v455_v63  ;;  %v460_v12 = vmax.f32 %v385_v49, 0.0  ;;  %v3665_v13 = vunpack.c.l.b16 %v759_v56  ;;  %v3691_v56 = vpop.f32.mrf.mxu1 }
  0xf2   :  { %v3667_v16 = vunpack.c.l.b16 %v761_v57  ;;  %v762_v6 = vpack.c.bf16 %v3657_v61, %v3657_v61  ;;  %v764_v7 = vpack.c.bf16 %v3659_v40, %v3659_v40  ;;  %v564_v21 = vadd.f32 %v458_v11, %v454_v59 }
  0xf3   :  { %v558_v17 = vrot.slane %v557_v60, 4  ;;  %v572_v20 = vrot.slane %v571_v10, 4  ;;  %v578_v22 = vadd.f32 %v460_v12, %v456_v9  ;;  %v763_v26 = vpack.c.bf16 %v3663_v5, %v3663_v5  ;;  %v3699_v11 = vpop.f32.mrf.mxu1 }
  0xf4   :  { %v3679_v31 = vmul.f32 0.0625, %v556_v8  ;;  %v276_v32 = vadd.f32 %v3639_v14, %v3607_v29  ;;  %v389_v35 = vadd.f32 %v3641_v15, %v3610_v30  ;;  %v565_v38 = vrot.slane %v564_v21, 4  ;;  %v3689_v14 = vpop.f32.mrf.mxu0 }
  0xf5   :  { %v559_v36 = vadd.f32 %v558_v17, %v557_v60  ;;  %v573_v37 = vadd.f32 %v572_v20, %v571_v10  ;;  %v579_v41 = vrot.slane %v578_v22, 4  ;;  %v278_v44 = vadd.f32 %v3643_v27, %v3613_v33 }
  0xf6   :  { %v461_v42 = vmax.f32 %v276_v32, 0.0  ;;  %v463_v43 = vmax.f32 %v389_v35, 0.0  ;;  %v391_v45 = vadd.f32 %v3645_v28, %v3615_v34  ;;  %v566_v54 = vadd.f32 %v565_v38, %v564_v21  ;;  %v3697_v10 = vpop.f32.mrf.mxu0 }
  0xf7   :  { %v560_v52 = vrot.slane %v559_v36, 2  ;;  %v574_v53 = vrot.slane %v573_v37, 2  ;;  %v580_v55 = vadd.f32 %v579_v41, %v578_v22  ;;  %v462_v15 = vmax.f32 %v278_v44, 0.0 }
  0xf8   :  { %v464_v57 = vmax.f32 %v391_v45, 0.0  ;;  %v280_v39 = vadd.f32 %v279_v48, %v3607_v29  ;;  %v393_v58 = vadd.f32 %v392_v51, %v3610_v30  ;;  %v567_v27 = vrot.slane %v566_v54, 2  ;;  %v291_v45 = vpop.f32.mrf.mxu0 }
  0xf9   :  { %v561_v62 = vadd.f32 %v560_v52, %v559_v36  ;;  %v575_v63 = vadd.f32 %v574_v53, %v573_v37  ;;  %v581_v0 = vrot.slane %v580_v55, 2  ;;  %v282_v3 = vadd.f32 %v281_v4, %v3613_v33 }
  0xfa   :  { %v465_v2 = vmax.f32 %v280_v39, 0.0  ;;  %v467_v28 = vmax.f32 %v393_v58, 0.0  ;;  %v395_v49 = vadd.f32 %v394_v50, %v3615_v34  ;;  %v568_v9 = vadd.f32 %v567_v27, %v566_v54 }
  0xfb   :  { %v562_v8 = vrot.slane %v561_v62, 1  ;;  %v576_v59 = vrot.slane %v575_v63, 1  ;;  %v582_v60 = vadd.f32 %v581_v0, %v580_v55  ;;  %v466_v12 = vmax.f32 %v282_v3, 0.0  ;;  %v3712_v3 = vpop.f32.mrf.mxu0 }
  0xfc   :  { %v585_v48 = vadd.f32 %v465_v2, %v461_v42  ;;  %v599_v51 = vadd.f32 %v467_v28, %v463_v43  ;;  %v468_v17 = vmax.f32 %v395_v49, 0.0  ;;  %v569_v22 = vrot.slane %v568_v9, 1  ;;  %v404_v42 = vpop.f32.mrf.mxu1 }
  0xfd   :  { %v563_v20 = vadd.f32 %v562_v8, %v561_v62  ;;  %v577_v21 = vadd.f32 %v576_v59, %v575_v63  ;;  %v583_v32 = vrot.slane %v582_v60, 1  ;;  %v592_v35 = vadd.f32 %v466_v12, %v462_v15 }
  0xfe   :  { %v586_v4 = vrot.slane %v585_v48, 4  ;;  %v600_v50 = vrot.slane %v599_v51, 4  ;;  %v606_v36 = vadd.f32 %v468_v17, %v464_v57  ;;  %v765_v37 = vpack.c.bf16 %v3679_v31, %v3679_v31  ;;  %v3714_v49 = vpop.f32.mrf.mxu1 }
  0xff   :  { %v734_v38 = vmul.f32 0.0625, %v563_v20  ;;  %v736_v41 = vmul.f32 0.0625, %v577_v21  ;;  %v570_v44 = vadd.f32 %v569_v22, %v568_v9  ;;  %v593_v53 = vrot.slane %v592_v35, 4  ;;  %v297_v22 = vpop.f32.mrf.mxu0 }
 0x100   :  { %v587_v43 = vadd.f32 %v586_v4, %v585_v48  ;;  %v601_v52 = vadd.f32 %v600_v50, %v599_v51  ;;  %v607_v54 = vrot.slane %v606_v36, 4  ;;  %v584_v62 = vadd.f32 %v583_v32, %v582_v60  ;;  %v410_v32 = vpop.f32.mrf.mxu1 }
 0x101   :  { %v766_v55 = vpack.c.bf16 %v734_v38, %v734_v38  ;;  %v768_v39 = vpack.c.bf16 %v736_v41, %v736_v41  ;;  %v735_v58 = vmul.f32 0.0625, %v570_v44  ;;  %v594_v15 = vadd.f32 %v593_v53, %v592_v35  ;;  %v299_v53 = vpop.f32.mrf.mxu0 }
 0x102   :  { %v588_v63 = vrot.slane %v587_v43, 2  ;;  %v602_v27 = vrot.slane %v601_v52, 2  ;;  %v608_v57 = vadd.f32 %v607_v54, %v606_v36  ;;  %v971_v31 = vunpack.c.l.b16 %v762_v6  ;;  %v412_v54 = vpop.f32.mrf.mxu1 }
 0x103   :  { %v973_v0 = vunpack.c.l.b16 %v764_v7  ;;  %v972_v2 = vunpack.c.l.b16 %v763_v26  ;;  %v974_v28 = vunpack.c.l.b16 %v765_v37  ;;  %v595_v9 = vrot.slane %v594_v15, 2 }
 0x104   :  { %v589_v8 = vadd.f32 %v588_v63, %v587_v43  ;;  %v603_v59 = vadd.f32 %v602_v27, %v601_v52  ;;  %v609_v60 = vrot.slane %v608_v57, 2  ;;  %v975_v48 = vunpack.c.l.b16 %v766_v55 }
 0x105   :  { %v977_v61 = vunpack.c.l.b16 %v768_v39  ;;  %v767_v6 = vpack.c.bf16 %v735_v58, %v735_v58  ;;  %v737_v51 = vmul.f32 0.0625, %v584_v62  ;;  %v596_v7 = vadd.f32 %v595_v9, %v594_v15 }
 0x106   :  { %v590_v12 = vrot.slane %v589_v8, 1  ;;  %v604_v40 = vrot.slane %v603_v59, 1  ;;  %v610_v17 = vadd.f32 %v609_v60, %v608_v57  ;;  %v1000_v5 = vsel %vm999_vm1, %v971_v31, %v3649_v46 }
 0x107   :  { %v1020_v26 = vsel %vm999_vm1, %v973_v0, %v3651_v47  ;;  %v286_v20 = vadd.f32 %v3673_v24, %v3607_v29  ;;  %v399_v21 = vadd.f32 %v3675_v25, %v3610_v30  ;;  %v597_v35 = vrot.slane %v596_v7, 1 }
 0x108   :  { %v591_v4 = vadd.f32 %v590_v12, %v589_v8  ;;  %v605_v50 = vadd.f32 %v604_v40, %v603_v59  ;;  %v611_v36 = vrot.slane %v610_v17, 1  ;;  %v1013_v37 = vsel %vm999_vm1, %v972_v2, %v3665_v13  ;;  %v301_v8 = vpop.f32.mrf.mxu0  ;;  %v414_v59 = vpop.f32.mrf.mxu1 }
 0x109   :  { %v3728_v46 = vsel %vm999_vm1, %v974_v28, %v3667_v16  ;;  %v3731_v47 = vsel %vm1001_vm2, %v975_v48, %v1000_v5  ;;  %v769_v24 = vpack.c.bf16 %v737_v51, %v737_v51  ;;  %v3734_v38 = vsel %vm1001_vm2, %v977_v61, %v1020_v26 }
 0x10a   :  { %v976_v25 = vunpack.c.l.b16 %v767_v6  ;;  %v288_v41 = vadd.f32 %v3689_v14, %v3613_v33  ;;  %v401_v44 = vadd.f32 %v3691_v56, %v3615_v34  ;;  %v469_v43 = vmax.f32 %v286_v20, 0.0 }
 0x10b   :  { %v471_v13 = vmax.f32 %v399_v21, 0.0  ;;  %v290_v16 = vadd.f32 %v3697_v10, %v3607_v29  ;;  %v403_v52 = vadd.f32 %v3699_v11, %v3610_v30  ;;  %v3744_v55 = vmul.f32 0.0625, %v591_v4  ;;  %v3769_v4 = vpop.f32.mrf.mxu0 }
 0x10c   :  { %v3746_v39 = vmul.f32 0.0625, %v605_v50  ;;  %v598_v58 = vadd.f32 %v597_v35, %v596_v7  ;;  %v612_v62 = vadd.f32 %v611_v36, %v610_v17  ;;  %v292_v56 = vadd.f32 %v291_v45, %v3613_v33  ;;  %v3771_v50 = vpop.f32.mrf.mxu1 }
 0x10d   :  { %v473_v14 = vmax.f32 %v290_v16, 0.0  ;;  %v475_v63 = vmax.f32 %v403_v52, 0.0  ;;  %v405_v27 = vadd.f32 %v404_v42, %v3615_v34  ;;  %v3751_v15 = vsel %vm1001_vm2, %v976_v25, %v1013_v37 }
 0x10e   :  { %v3753_v10 = vunpack.c.l.b16 %v769_v24  ;;  %v470_v11 = vmax.f32 %v288_v41, 0.0  ;;  %v472_v57 = vmax.f32 %v401_v44, 0.0  ;;  %v474_v2 = vmax.f32 %v292_v56, 0.0 }
 0x10f   :  { %v613_v31 = vadd.f32 %v473_v14, %v469_v43  ;;  %v627_v0 = vadd.f32 %v475_v63, %v471_v13  ;;  %v476_v28 = vmax.f32 %v405_v27, 0.0  ;;  %v770_v9 = vpack.c.bf16 %v3744_v55, %v3744_v55  ;;  %v3779_v14 = vpop.f32.mrf.mxu1 }
 0x110   :  { %v772_v45 = vpack.c.bf16 %v3746_v39, %v3746_v39  ;;  %v3759_v42 = vmul.f32 0.0625, %v598_v58  ;;  %v3761_v60 = vmul.f32 0.0625, %v612_v62  ;;  %v620_v6 = vadd.f32 %v474_v2, %v470_v11  ;;  %v3777_v62 = vpop.f32.mrf.mxu0 }
 0x111   :  { %v614_v48 = vrot.slane %v613_v31, 4  ;;  %v628_v61 = vrot.slane %v627_v0, 4  ;;  %v634_v51 = vadd.f32 %v476_v28, %v472_v57  ;;  %v296_v12 = vadd.f32 %v3712_v3, %v3607_v29 }
 0x112   :  { %v409_v40 = vadd.f32 %v3714_v49, %v3610_v30  ;;  %v298_v7 = vadd.f32 %v297_v22, %v3613_v33  ;;  %v411_v17 = vadd.f32 %v410_v32, %v3615_v34  ;;  %v621_v20 = vrot.slane %v620_v6, 4 }
 0x113   :  { %v615_v5 = vadd.f32 %v614_v48, %v613_v31  ;;  %v629_v26 = vadd.f32 %v628_v61, %v627_v0  ;;  %v635_v21 = vrot.slane %v634_v51, 4  ;;  %v477_v35 = vmax.f32 %v296_v12, 0.0  ;;  %v422_v12 = vpop.f32.mrf.mxu1 }
 0x114   :  { %v479_v36 = vmax.f32 %v409_v40, 0.0  ;;  %v478_v37 = vmax.f32 %v298_v7, 0.0  ;;  %v480_v24 = vmax.f32 %v411_v17, 0.0  ;;  %v622_v41 = vadd.f32 %v621_v20, %v620_v6 }
 0x115   :  { %v616_v3 = vrot.slane %v615_v5, 2  ;;  %v630_v25 = vrot.slane %v629_v26, 2  ;;  %v636_v49 = vadd.f32 %v635_v21, %v634_v51  ;;  %v300_v22 = vadd.f32 %v299_v53, %v3607_v29  ;;  %v309_v51 = vpop.f32.mrf.mxu0 }
 0x116   :  { %v413_v32 = vadd.f32 %v412_v54, %v3610_v30  ;;  %v302_v44 = vadd.f32 %v301_v8, %v3613_v33  ;;  %v415_v43 = vadd.f32 %v414_v59, %v3615_v34  ;;  %v623_v52 = vrot.slane %v622_v41, 2 }
 0x117   :  { %v617_v13 = vadd.f32 %v616_v3, %v615_v5  ;;  %v631_v16 = vadd.f32 %v630_v25, %v629_v26  ;;  %v637_v58 = vrot.slane %v636_v49, 2  ;;  %v481_v63 = vmax.f32 %v300_v22, 0.0 }
 0x118   :  { %v483_v56 = vmax.f32 %v413_v32, 0.0  ;;  %v482_v27 = vmax.f32 %v302_v44, 0.0  ;;  %v484_v11 = vmax.f32 %v415_v43, 0.0  ;;  %v624_v31 = vadd.f32 %v623_v52, %v622_v41  ;;  %v311_v32 = vpop.f32.mrf.mxu0  ;;  %v424_v44 = vpop.f32.mrf.mxu1 }
 0x119   :  { %v618_v57 = vrot.slane %v617_v13, 1  ;;  %v632_v53 = vrot.slane %v631_v16, 1  ;;  %v638_v54 = vadd.f32 %v637_v58, %v636_v49  ;;  %v641_v0 = vadd.f32 %v481_v63, %v477_v35 }
 0x11a   :  { %v655_v2 = vadd.f32 %v483_v56, %v479_v36  ;;  %v648_v28 = vadd.f32 %v482_v27, %v478_v37  ;;  %v662_v8 = vadd.f32 %v484_v11, %v480_v24  ;;  %v625_v61 = vrot.slane %v624_v31, 1  ;;  %v315_v39 = vpop.f32.mrf.mxu0 }
 0x11b   :  { %v619_v59 = vadd.f32 %v618_v57, %v617_v13  ;;  %v633_v48 = vadd.f32 %v632_v53, %v631_v16  ;;  %v639_v6 = vrot.slane %v638_v54, 1  ;;  %v642_v40 = vrot.slane %v641_v0, 4 }
 0x11c   :  { %v656_v7 = vrot.slane %v655_v2, 4  ;;  %v649_v17 = vrot.slane %v648_v28, 4  ;;  %v663_v5 = vrot.slane %v662_v8, 4  ;;  %v626_v21 = vadd.f32 %v625_v61, %v624_v31 }
 0x11d   :  { %v742_v26 = vmul.f32 0.0625, %v619_v59  ;;  %v744_v20 = vmul.f32 0.0625, %v633_v48  ;;  %v640_v3 = vadd.f32 %v639_v6, %v638_v54  ;;  %v643_v25 = vadd.f32 %v642_v40, %v641_v0 }
 0x11e   :  { %v657_v35 = vadd.f32 %v656_v7, %v655_v2  ;;  %v650_v36 = vadd.f32 %v649_v17, %v648_v28  ;;  %v664_v37 = vadd.f32 %v663_v5, %v662_v8  ;;  %v743_v49 = vmul.f32 0.0625, %v626_v21 }
 0x11f   :  { %v774_v24 = vpack.c.bf16 %v742_v26, %v742_v26  ;;  %v776_v41 = vpack.c.bf16 %v744_v20, %v744_v20  ;;  %v745_v22 = vmul.f32 0.0625, %v640_v3  ;;  %v644_v43 = vrot.slane %v643_v25, 2 }
 0x120   :  { %v658_v13 = vrot.slane %v657_v35, 2  ;;  %v651_v16 = vrot.slane %v650_v36, 2  ;;  %v665_v52 = vrot.slane %v664_v37, 2  ;;  %v979_v58 = vunpack.c.l.b16 %v770_v9 }
 0x121   :  { %v981_v63 = vunpack.c.l.b16 %v772_v45  ;;  %v771_v56 = vpack.c.bf16 %v3759_v42, %v3759_v42  ;;  %v773_v27 = vpack.c.bf16 %v3761_v60, %v3761_v60  ;;  %v3794_v11 = vsel %vm1001_vm2, %v3753_v10, %v3728_v46  ;;  %v428_v45 = vpop.f32.mrf.mxu1 }
 0x122   :  { %v645_v57 = vadd.f32 %v644_v43, %v643_v25  ;;  %v659_v53 = vadd.f32 %v658_v13, %v657_v35  ;;  %v652_v31 = vadd.f32 %v651_v16, %v650_v36  ;;  %v983_v55 = vunpack.c.l.b16 %v774_v24 }
 0x123   :  { %v985_v9 = vunpack.c.l.b16 %v776_v41  ;;  %v775_v54 = vpack.c.bf16 %v743_v49, %v743_v49  ;;  %v777_v0 = vpack.c.bf16 %v745_v22, %v745_v22  ;;  %v666_v8 = vadd.f32 %v665_v52, %v664_v37  ;;  %v430_v5 = vpop.f32.mrf.mxu1 }
 0x124   :  { %v646_v2 = vrot.slane %v645_v57, 1  ;;  %v660_v28 = vrot.slane %v659_v53, 1  ;;  %v653_v42 = vrot.slane %v652_v31, 1  ;;  %v1004_v60 = vsel %vm1003_vm3, %v979_v58, %v3731_v47 }
 0x125   :  { %v1022_v46 = vsel %vm1003_vm3, %v981_v63, %v3734_v38  ;;  %v3800_v10 = vunpack.c.l.b16 %v771_v56  ;;  %v3802_v59 = vunpack.c.l.b16 %v773_v27  ;;  %v306_v48 = vadd.f32 %v3769_v4, %v3607_v29  ;;  %v317_v4 = vpop.f32.mrf.mxu0  ;;  %v432_v16 = vpop.f32.mrf.mxu1 }
 0x126   :  { %v419_v61 = vadd.f32 %v3771_v50, %v3610_v30  ;;  %v308_v6 = vadd.f32 %v3777_v62, %v3613_v33  ;;  %v421_v40 = vadd.f32 %v3779_v14, %v3615_v34  ;;  %v3813_v47 = vsel %vm1005_vm4, %v983_v55, %v1004_v60 }
 0x127   :  { %v3816_v38 = vsel %vm1005_vm4, %v985_v9, %v1022_v46  ;;  %v3818_v7 = vunpack.c.l.b16 %v775_v54  ;;  %v3820_v17 = vunpack.c.l.b16 %v777_v0  ;;  %v647_v26 = vadd.f32 %v646_v2, %v645_v57  ;;  %v319_v13 = vpop.f32.mrf.mxu0 }
 0x128   :  { %v661_v50 = vadd.f32 %v660_v28, %v659_v53  ;;  %v654_v20 = vadd.f32 %v653_v42, %v652_v31  ;;  %v667_v21 = vrot.slane %v666_v8, 1  ;;  %v310_v62 = vadd.f32 %v309_v51, %v3607_v29  ;;  %v434_v28 = vpop.f32.mrf.mxu1 }
 0x129   :  { %v423_v14 = vadd.f32 %v422_v12, %v3610_v30  ;;  %v312_v3 = vadd.f32 %v311_v32, %v3613_v33  ;;  %v425_v25 = vadd.f32 %v424_v44, %v3615_v34  ;;  %v485_v35 = vmax.f32 %v306_v48, 0.0  ;;  %v321_v2 = vpop.f32.mrf.mxu0 }
 0x12a   :  { %v487_v36 = vmax.f32 %v419_v61, 0.0  ;;  %v486_v37 = vmax.f32 %v308_v6, 0.0  ;;  %v488_v24 = vmax.f32 %v421_v40, 0.0  ;;  %v489_v41 = vmax.f32 %v310_v62, 0.0 }
 0x12b   :  { %v491_v49 = vmax.f32 %v423_v14, 0.0  ;;  %v490_v22 = vmax.f32 %v312_v3, 0.0  ;;  %v492_v43 = vmax.f32 %v425_v25, 0.0  ;;  %v3826_v52 = vmul.f32 0.0625, %v647_v26 }
 0x12c   :  { %v3828_v58 = vmul.f32 0.0625, %v661_v50  ;;  %v3830_v51 = vmul.f32 0.0625, %v654_v20  ;;  %v668_v12 = vadd.f32 %v667_v21, %v666_v8  ;;  %v669_v32 = vadd.f32 %v489_v41, %v485_v35 }
 0x12d   :  { %v683_v63 = vadd.f32 %v491_v49, %v487_v36  ;;  %v676_v44 = vadd.f32 %v490_v22, %v486_v37  ;;  %v690_v56 = vadd.f32 %v492_v43, %v488_v24  ;;  %v316_v27 = vadd.f32 %v315_v39, %v3607_v29 }
 0x12e   :  { %v429_v57 = vadd.f32 %v428_v45, %v3610_v30  ;;  %v318_v53 = vadd.f32 %v317_v4, %v3613_v33  ;;  %v431_v31 = vadd.f32 %v430_v5, %v3615_v34  ;;  %v670_v55 = vrot.slane %v669_v32, 4 }
 0x12f   :  { %v684_v9 = vrot.slane %v683_v63, 4  ;;  %v677_v54 = vrot.slane %v676_v44, 4  ;;  %v691_v0 = vrot.slane %v690_v56, 4  ;;  %v493_v42 = vmax.f32 %v316_v27, 0.0 }
 0x130   :  { %v495_v8 = vmax.f32 %v429_v57, 0.0  ;;  %v494_v60 = vmax.f32 %v318_v53, 0.0  ;;  %v496_v46 = vmax.f32 %v431_v31, 0.0  ;;  %v671_v48 = vadd.f32 %v670_v55, %v669_v32 }
 0x131   :  { %v685_v61 = vadd.f32 %v684_v9, %v683_v63  ;;  %v678_v6 = vadd.f32 %v677_v54, %v676_v44  ;;  %v692_v39 = vadd.f32 %v691_v0, %v690_v56  ;;  %v320_v45 = vadd.f32 %v319_v13, %v3607_v29 }
 0x132   :  { %v433_v40 = vadd.f32 %v432_v16, %v3610_v30  ;;  %v322_v4 = vadd.f32 %v321_v2, %v3613_v33  ;;  %v435_v5 = vadd.f32 %v434_v28, %v3615_v34  ;;  %v672_v26 = vrot.slane %v671_v48, 2 }
 0x133   :  { %v686_v50 = vrot.slane %v685_v61, 2  ;;  %v679_v20 = vrot.slane %v678_v6, 2  ;;  %v693_v21 = vrot.slane %v692_v39, 2  ;;  %v497_v62 = vmax.f32 %v320_v45, 0.0 }
 0x134   :  { %v499_v14 = vmax.f32 %v433_v40, 0.0  ;;  %v498_v3 = vmax.f32 %v322_v4, 0.0  ;;  %v500_v25 = vmax.f32 %v435_v5, 0.0  ;;  %v673_v35 = vadd.f32 %v672_v26, %v671_v48 }
 0x135   :  { %v687_v36 = vadd.f32 %v686_v50, %v685_v61  ;;  %v680_v37 = vadd.f32 %v679_v20, %v678_v6  ;;  %v694_v24 = vadd.f32 %v693_v21, %v692_v39  ;;  %v697_v41 = vadd.f32 %v497_v62, %v493_v42 }
 0x136   :  { %v711_v29 = vadd.f32 %v499_v14, %v495_v8  ;;  %v704_v49 = vadd.f32 %v498_v3, %v494_v60  ;;  %v718_v30 = vadd.f32 %v500_v25, %v496_v46  ;;  %v674_v22 = vrot.slane %v673_v35, 1 }
 0x137   :  { %v688_v33 = vrot.slane %v687_v36, 1  ;;  %v681_v43 = vrot.slane %v680_v37, 1  ;;  %v695_v34 = vrot.slane %v694_v24, 1  ;;  %v698_v13 = vrot.slane %v697_v41, 4 }
 0x138   :  { %v712_v16 = vrot.slane %v711_v29, 4  ;;  %v705_v32 = vrot.slane %v704_v49, 4  ;;  %v719_v63 = vrot.slane %v718_v30, 4  ;;  %v675_v44 = vadd.f32 %v674_v22, %v673_v35 }
 0x139   :  { %v689_v56 = vadd.f32 %v688_v33, %v687_v36  ;;  %v682_v27 = vadd.f32 %v681_v43, %v680_v37  ;;  %v696_v57 = vadd.f32 %v695_v34, %v694_v24  ;;  %v699_v53 = vadd.f32 %v698_v13, %v697_v41 }
 0x13a   :  { %v713_v31 = vadd.f32 %v712_v16, %v711_v29  ;;  %v706_v55 = vadd.f32 %v705_v32, %v704_v49  ;;  %v720_v9 = vadd.f32 %v719_v63, %v718_v30  ;;  %v749_v54 = vmul.f32 0.0625, %v668_v12 }
 0x13b   :  { %v750_v0 = vmul.f32 0.0625, %v675_v44  ;;  %v752_v2 = vmul.f32 0.0625, %v689_v56  ;;  %v751_v28 = vmul.f32 0.0625, %v682_v27  ;;  %v700_v42 = vrot.slane %v699_v53, 2 }
 0x13c   :  { %v714_v8 = vrot.slane %v713_v31, 2  ;;  %v707_v60 = vrot.slane %v706_v55, 2  ;;  %v721_v46 = vrot.slane %v720_v9, 2  ;;  %v778_v48 = vpack.c.bf16 %v3826_v52, %v3826_v52 }
 0x13d   :  { %v780_v61 = vpack.c.bf16 %v3828_v58, %v3828_v58  ;;  %v779_v6 = vpack.c.bf16 %v3830_v51, %v3830_v51  ;;  %v753_v39 = vmul.f32 0.0625, %v696_v57  ;;  %v701_v45 = vadd.f32 %v700_v42, %v699_v53 }
 0x13e   :  { %v715_v12 = vadd.f32 %v714_v8, %v713_v31  ;;  %v708_v40 = vadd.f32 %v707_v60, %v706_v55  ;;  %v722_v4 = vadd.f32 %v721_v46, %v720_v9  ;;  %v781_v5 = vpack.c.bf16 %v749_v54, %v749_v54  ;;  %v3121_v60 = vld [vmem:[%s4164_s3 + $0xb0] ss:$12 sps:$4 sm:$0xff]  }
 0x13f   :  { %v782_v26 = vpack.c.bf16 %v750_v0, %v750_v0  ;;  %v784_v50 = vpack.c.bf16 %v752_v2, %v752_v2  ;;  %v783_v20 = vpack.c.bf16 %v751_v28, %v751_v28  ;;  %v702_v21 = vrot.slane %v701_v45, 1 }
 0x140   :  { %v716_v62 = vrot.slane %v715_v12, 1  ;;  %v709_v14 = vrot.slane %v708_v40, 1  ;;  %v723_v52 = vrot.slane %v722_v4, 1  ;;  %v987_v3 = vunpack.c.l.b16 %v778_v48 }
 0x141   :  { %v989_v25 = vunpack.c.l.b16 %v780_v61  ;;  %v988_v58 = vunpack.c.l.b16 %v779_v6  ;;  %v785_v35 = vpack.c.bf16 %v753_v39, %v753_v39  ;;  %v703_v36 = vadd.f32 %v702_v21, %v701_v45  ;;  %v3122_v61 = vld [vmem:[%s4164_s3 + $0x230] ss:$12 sps:$4 sm:$0xff]   ;;  %v3123_v39 = vld [vmem:[%s4164_s3 + $0x158] ss:$12 sps:$4 sm:$0xff]   ;;  %v3132_v21 = vld [vmem:[%s4164_s3 + $0x2a8] ss:$12 sps:$4 sm:$0xff]  }
 0x142   :  { %v717_v51 = vadd.f32 %v716_v62, %v715_v12  ;;  %v710_v37 = vadd.f32 %v709_v14, %v708_v40  ;;  %v724_v24 = vadd.f32 %v723_v52, %v722_v4  ;;  %v990_v41 = vunpack.c.l.b16 %v781_v5  ;;  %v3124_v45 = vld [vmem:[%s4164_s3 + $0x2d8] ss:$12 sps:$4 sm:$0xff]   ;;  %v3127_v4 = vld [vmem:[%s4164_s3 + $0x140] ss:$12 sps:$4 sm:$0xff]   ;;  %v3133_v62 = vld [vmem:[%s4164_s3 + $0x68] ss:$12 sps:$4 sm:$0xff]  }
 0x143   :  { %v991_v29 = vunpack.c.l.b16 %v782_v26  ;;  %v993_v49 = vunpack.c.l.b16 %v784_v50  ;;  %v992_v30 = vunpack.c.l.b16 %v783_v20  ;;  %v754_v22 = vmul.f32 0.0625, %v703_v36  ;;  %v3125_v12 = vld [vmem:[%s4164_s3 + $0x98] ss:$12 sps:$4 sm:$0xff]   ;;  %v3128_v5 = vld [vmem:[%s4164_s3 + $0x2c0] ss:$12 sps:$4 sm:$0xff]  }
 0x144   :  { %v756_v33 = vmul.f32 0.0625, %v717_v51  ;;  %v755_v43 = vmul.f32 0.0625, %v710_v37  ;;  %v757_v34 = vmul.f32 0.0625, %v724_v24  ;;  %v994_v13 = vunpack.c.l.b16 %v785_v35  ;;  %v3126_v40 = vld [vmem:[%s4164_s3 + $0x218] ss:$12 sps:$4 sm:$0xff]  }
 0x145   :  { %v1015_v16 = vsel %vm1003_vm3, %v3800_v10, %v3751_v15  ;;  %v1029_v32 = vsel %vm1003_vm3, %v3802_v59, %v3794_v11  ;;  %v1008_v63 = vsel %vm1007_vm5, %v987_v3, %v3813_v47  ;;  %v786_v44 = vpack.c.bf16 %v754_v22, %v754_v22  ;;  %v3129_v26 = vld [vmem:[%s4164_s3 + $0x80] ss:$12 sps:$4 sm:$0xff]   ;;  %v3131_v20 = vld [vmem:[%s4164_s3 + $0x128] ss:$12 sps:$4 sm:$0xff]   ;;  %v3135_v52 = vld [vmem:[%s4164_s3 + $0x110] ss:$12 sps:$4 sm:$0xff]  }
 0x146   :  { %v788_v56 = vpack.c.bf16 %v756_v33, %v756_v33  ;;  %v787_v27 = vpack.c.bf16 %v755_v43, %v755_v43  ;;  %v1024_v57 = vsel %vm1007_vm5, %v989_v25, %v3816_v38  ;;  %v1016_v53 = vsel %vm1005_vm4, %v3818_v7, %v1015_v16  ;;  %v3130_v50 = vld [vmem:[%s4164_s3 + $0x200] ss:$12 sps:$4 sm:$0xff]   ;;  %v3134_v14 = vld [vmem:[%s4164_s3 + $0x1e8] ss:$12 sps:$4 sm:$0xff]   ;;  %v3136_v3 = vld [vmem:[%s4164_s3 + $0x290] ss:$12 sps:$4 sm:$0xff]  }
 0x147   :  { %v789_v31 = vpack.c.bf16 %v757_v34, %v757_v34  ;;  %v1030_v15 = vsel %vm1005_vm4, %v3820_v17, %v1029_v32  ;;  %v1010_v10 = vsel %vm1009_vm6, %v991_v29, %v1008_v63  ;;  %v995_v55 = vunpack.c.l.b16 %v786_v44  ;;  %v3137_v25 = vld [vmem:[%s4164_s3 + $0x50] ss:$12 sps:$4 sm:$0xff]   ;;  %v3139_v35 = vld [vmem:[%s4164_s3 + $0xf8] ss:$12 sps:$4 sm:$0xff]   ;;  %v3143_v24 = vld [vmem:[%s4164_s3 + $0xe0] ss:$12 sps:$4 sm:$0xff]  }
 0x148   :  { %v997_v11 = vunpack.c.l.b16 %v788_v56  ;;  %v996_v59 = vunpack.c.l.b16 %v787_v27  ;;  %v1017_v47 = vsel %vm1007_vm5, %v988_v58, %v1016_v53  ;;  %v1031_v0 = vsel %vm1007_vm5, %v990_v41, %v1030_v15  ;;  %v3138_v58 = vld [vmem:[%s4164_s3 + $0x1d0] ss:$12 sps:$4 sm:$0xff]   ;;  %v3140_v36 = vld [vmem:[%s4164_s3 + $0x278] ss:$12 sps:$4 sm:$0xff]   ;;  %v3144_v41 = vld [vmem:[%s4164_s3 + $0x260] ss:$12 sps:$4 sm:$0xff]  }
 0x149   :  { %v1018_v9 = vsel %vm1009_vm6, %v992_v30, %v1017_v47  ;;  %v998_v54 = vunpack.c.l.b16 %v789_v31  ;;  %v1025_v38 = vsel %vm1009_vm6, %v993_v49, %v1024_v57  ;;  %v1032_v2 = vsel %vm1009_vm6, %v994_v13, %v1031_v0  ;;  %v3141_v51 = vld [vmem:[%s4164_s3 + $0x38] ss:$12 sps:$4 sm:$0xff]   ;;  %v3145_v29 = vld [vmem:[%s4164_s3 + $0x20] ss:$12 sps:$4 sm:$0xff]   ;;  %v3147_v30 = vld [vmem:[%s4164_s3 + $0xc8] ss:$12 sps:$4 sm:$0xff]  }
 0x14a   :  { %v1019_v7 = vsel %vm1011_vm7, %v996_v59, %v1018_v9  ;;  %v1012_v17 = vsel %vm1011_vm7, %v995_v55, %v1010_v10  ;;  %v1026_v28 = vsel %vm1011_vm7, %v997_v11, %v1025_v38  ;;  %v3142_v37 = vld [vmem:[%s4164_s3 + $0x1b8] ss:$12 sps:$4 sm:$0xff]   ;;  %v3146_v49 = vld [vmem:[%s4164_s3 + $0x1a0] ss:$12 sps:$4 sm:$0xff]   ;;  %v3148_v22 = vld [vmem:[%s4164_s3 + $0x248] ss:$12 sps:$4 sm:$0xff]  }
 0x14b   :  { %v1035_v42 = vpack.c.b16 %v1019_v7, %v1019_v7  ;;  %v1033_v8 = vsel %vm1011_vm7, %v998_v54, %v1032_v2  ;;  %v3873_v48 = vpack.c.b16 %v1012_v17, %v1012_v17  ;;  %v3878_v6 = vpack.c.b16 %v1026_v28, %v1026_v28  ;;  %v3149_v33 = vld [vmem:[%s4164_s3 + $0x8] ss:$12 sps:$4 sm:$0xff]   ;;  %v3151_v34 = vld [vmem:[%s4166_s5 + $0x18] ss:$12 sps:$4 sm:$0xff]   ;;  %v3154_v32 = vld [vmem:[%s4166_s5 + $0x20] ss:$12 sps:$4 sm:$0xff]  }
 0x14c   :  { %v1037_v46 = vpack.c.b16 %v1033_v8, %v1033_v8  ;;  %v3150_v43 = vld [vmem:[%s4164_s3 + $0x188] ss:$12 sps:$4 sm:$0xff]   ;;  %v3256_v13 = vmov 0.0   ;;  %v3155_v63 = vld [vmem:[%s4166_s5] ss:$12 sps:$4 sm:$0xff]  }
 0x14d   :  { %1586 = vmatprep.mubr.bf16.mxu0 %v1035_v42  ;;  %v3153_v16 = vld [vmem:[%s4166_s5 + $0x1c] ss:$12 sps:$4 sm:$0xff]   ;;  %v3157_v44 = vld [vmem:[%s4166_s5 + $0x4] ss:$12 sps:$4 sm:$0xff]  }
 0x14e   :  { %1627 = vmatprep.mubr.bf16.mxu1 %v1037_v46  ;;  %1587 = vmatmul.mubr.bf16.vlgmr.msra.gmra.mxu0 %v3873_v48  ;;  %v3158_v56 = vld [vmem:[%s4166_s5 + $0x8] ss:$12 sps:$4 sm:$0xff]  }
 0x14f   :  { %1628 = vmatmul.mubr.bf16.vlgmr.msra.gmra.mxu1 %v3878_v6  ;;  %2874 = vmatpush3.bf16.msra.mxu0 %v3121_v60  ;;  %v918_v27 = vld [vmem:[%s4167_s6] ss:$4 sm:$0x7] }
 0x150   :  { %2896 = vmatpush3.bf16.msra.mxu1 %v3122_v61  ;;  %1668 = vmatprep.mubr.bf16.mxu0 %v1035_v42  ;;  %v923_v57 = vrot.slane %v918_v27, %v3579_v18  ;;  %v927_v11 = vrot.slane %v918_v27, %v3592_v23 }
 0x151   :  { %1708 = vmatprep.mubr.bf16.mxu1 %v1037_v46  ;;  %2875 = vmatprep.subr.bf16.mxu0 %v3123_v39 }
 0x152   :  { %2897 = vmatprep.subr.bf16.mxu1 %v3124_v45 }
 0x153   :  { %2876 = vmatpush3.bf16.msra.mxu0 %v3125_v12 }
 0x154   :  { %2898 = vmatpush3.bf16.msra.mxu1 %v3126_v40  ;;  %2877 = vmatprep.subr.bf16.mxu0 %v3127_v4 }
 0x155   :  { %2899 = vmatprep.subr.bf16.mxu1 %v3128_v5 }
 0x157   :  { %2878 = vmatpush3.bf16.msra.mxu0 %v3129_v26 }
 0x158   :  { %2900 = vmatpush3.bf16.msra.mxu1 %v3130_v50  ;;  %2879 = vmatprep.subr.bf16.mxu0 %v3131_v20 }
 0x159   :  { %2901 = vmatprep.subr.bf16.mxu1 %v3132_v21 }
 0x15b   :  { %2880 = vmatpush3.bf16.msra.mxu0 %v3133_v62 }
 0x15c   :  { %2902 = vmatpush3.bf16.msra.mxu1 %v3134_v14  ;;  %2881 = vmatprep.subr.bf16.mxu0 %v3135_v52 }
 0x15d   :  { %2903 = vmatprep.subr.bf16.mxu1 %v3136_v3 }
 0x15f   :  { %2882 = vmatpush3.bf16.msra.mxu0 %v3137_v25 }
 0x160   :  { %2904 = vmatpush3.bf16.msra.mxu1 %v3138_v58  ;;  %2883 = vmatprep.subr.bf16.mxu0 %v3139_v35 }
 0x161   :  { %2905 = vmatprep.subr.bf16.mxu1 %v3140_v36 }
 0x163   :  { %2884 = vmatpush3.bf16.msra.mxu0 %v3141_v51  ;;  %v3159_v51 = vld [vmem:[%s4169_s4 + $0x18] ss:$12 sps:$4 sm:$0xff]  }
 0x164   :  { %2906 = vmatpush3.bf16.msra.mxu1 %v3142_v37  ;;  %2885 = vmatprep.subr.bf16.mxu0 %v3143_v24  ;;  %v3161_v37 = vld [vmem:[%s4169_s4 + $0x1c] ss:$12 sps:$4 sm:$0xff]   ;;  %v3162_v24 = vld [vmem:[%s4169_s4 + $0x20] ss:$12 sps:$4 sm:$0xff]  }
 0x165   :  { %2907 = vmatprep.subr.bf16.mxu1 %v3144_v41  ;;  %v3163_v41 = vld [vmem:[%s4169_s4] ss:$12 sps:$4 sm:$0xff]  }
 0x167   :  { %2886 = vmatpush3.bf16.msra.mxu0 %v3145_v29  ;;  %v3165_v29 = vld [vmem:[%s4169_s4 + $0x4] ss:$12 sps:$4 sm:$0xff]  }
 0x168   :  { %2908 = vmatpush3.bf16.msra.mxu1 %v3146_v49  ;;  %2887 = vmatprep.subr.bf16.mxu0 %v3147_v30  ;;  %v3166_v49 = vld [vmem:[%s4169_s4 + $0x8] ss:$12 sps:$4 sm:$0xff]  }
 0x169   :  { %2909 = vmatprep.subr.bf16.mxu1 %v3148_v22 }
 0x16b   :  { %2888 = vmatpush3.bf16.msra.mxu0 %v3149_v33 }
 0x16c   :  { %2910 = vmatpush3.bf16.msra.mxu1 %v3150_v43  ;;  %1795 = vmatprep.subr.bf16.mxu0 %v3153_v16 }
 0x16d   :  { %2938 = vmatprep.subr.bf16.mxu1 %v3256_v13 }
 0x16e   :  { %1669 = vmatmul.mubr.bf16.vlgmr.msra.gmra.mxu0 %v3873_v48  ;;  %v931_v48 = vrot.slane %v918_v27, %v3581_v19 }
 0x16f   :  { %1709 = vmatmul.mubr.bf16.vlgmr.msra.gmra.mxu1 %v3878_v6  ;;  %1815 = vmatprep.mubr.bf16.mxu0 %v3255_v1  ;;  %v2783_v6 = vld [vmem:[%s4168_s7] ss:$0 sm:$0xff] }
 0x170   :  { %2942 = vmatprep.mubr.msk.bf16.mxu1 %vm3257_vm8, %v3256_v13  ;;  %1796 = vmatpush1.bf16.msra.mxu0 %v3151_v34 }
 0x171   :  { %2939 = vmatpush3.bf16.msra.mxu1 %v3154_v32  ;;  %1797 = vmatprep.subr.bf16.mxu0 %v3157_v44 }
 0x172   :  { %2940 = vmatprep.subr.bf16.mxu1 %v3256_v13 }
 0x174   :  { %1798 = vmatpush1.bf16.msra.mxu0 %v3155_v63 }
 0x175   :  { %2941 = vmatpush3.bf16.msra.mxu1 %v3158_v56  ;;  %1960 = vmatprep.subr.bf16.mxu0 %v3161_v37 }
 0x176   :  { %2946 = vmatprep.subr.bf16.mxu1 %v3256_v13 }
 0x20e   :  { %v1588_v53 = vpop.f32.mrf.mxu0 }
 0x20f   :  { %v1589_v31 = vadd.f32 %v1588_v53, %v923_v57  ;;  %v1629_v15 = vpop.f32.mrf.mxu1 }
 0x210   :  { %v1590_v10 = vpop.f32.mrf.mxu0 }
 0x211   :  { %v3996_v55 = vadd.f32 %v1629_v15, %v1589_v31  ;;  %v1631_v59 = vpop.f32.mrf.mxu1  ;;  %v1591_v38 = vadd.f32 %v1590_v10, %v927_v11 }
 0x212   :  { %v1592_v47 = vpop.f32.mrf.mxu0 }
 0x213   :  { %v2781_v9 = vmul.f32 -1.442695, %v3996_v55  ;;  %v1633_v54 = vpop.f32.mrf.mxu1  ;;  %v4000_v2 = vadd.f32 %v1631_v59, %v1591_v38 }
 0x214   :  { %v1593_v0 = vpop.f32.mrf.mxu0 }
 0x215   :  { %3195 = vpow2.f32 %v2781_v9  ;;  %v1634_v7 = vpop.f32.mrf.mxu1  ;;  %v2782_v17 = vmul.f32 -1.442695, %v4000_v2 }
 0x217   :  { %3197 = vpow2.f32 %v2782_v17 }
 0x222   :  { %v3196_v28 = vpop.eup %3195 }
 0x223   :  { %v1720_v42 = vadd.f32 1.0, %v3196_v28  ;;  %v3167_v28 = vld [vmem:[%s4166_s5 + $0x48] ss:$12 sps:$4 sm:$0xff]  }
 0x224   :  { %v3198_v8 = vpop.eup %3197 }
 0x225   :  { %3199 = vrcp.f32 %v1720_v42  ;;  %v1726_v39 = vadd.f32 1.0, %v3198_v8  ;;  %v3169_v42 = vld [vmem:[%s4166_s5 + $0x4c] ss:$12 sps:$4 sm:$0xff]   ;;  %v3170_v8 = vld [vmem:[%s4166_s5 + $0x50] ss:$12 sps:$4 sm:$0xff]  }
 0x227   :  { %3201 = vrcp.f32 %v1726_v39 }
 0x22e   :  { %v2889_v60 = vpop.f32.mrf.mxu0 }
 0x22f   :  { %v2911_v46 = vpop.f32.mrf.mxu1 }
 0x230   :  { %v2890_v61 = vpop.f32.mrf.mxu0 }
 0x231   :  { %v2891_v45 = vadd.f32 %v2890_v61, %v2889_v60  ;;  %v2912_v12 = vpop.f32.mrf.mxu1  ;;  %v3173_v60 = vld [vmem:[%s4166_s5 + $0x34] ss:$12 sps:$4 sm:$0xff]  }
 0x232   :  { %v3200_v40 = vpop.eup %3199  ;;  %v2892_v4 = vpop.f32.mrf.mxu0  ;;  %v2913_v26 = vadd.f32 %v2912_v12, %v2911_v46  ;;  %v3174_v46 = vld [vmem:[%s4166_s5 + $0x38] ss:$12 sps:$4 sm:$0xff]  }
 0x233   :  { %v1671_v5 = vadd.f32 %v2891_v45, %v931_v48  ;;  %v1733_v50 = vmul.f32 %v3200_v40, %v2783_v6  ;;  %v2914_v20 = vpop.f32.mrf.mxu1  ;;  %v3171_v48 = vld [vmem:[%s4166_s5 + $0x30] ss:$12 sps:$4 sm:$0xff]   ;;  %v2794_v61 = vld [vmem:[%s4167_s6 + $0x1] ss:$4 sm:$0x7] }
 0x234   :  { %v2893_v21 = vpop.f32.mrf.mxu0  ;;  %v3202_v3 = vpop.eup %3201 }
 0x235   :  { %v1711_v62 = vadd.f32 %v2913_v26, %v1671_v5  ;;  %v2915_v14 = vpop.f32.mrf.mxu1  ;;  %v1736_v25 = vsub.f32 1.0, %v3202_v3  ;;  %v1909_v5 = vrot.slane %v2794_v61, %v3581_v19  ;;  %v1905_v26 = vrot.slane %v2794_v61, %v3592_v23 }
 0x237   :  { %v1734_v52 = vadd.f32 %v1733_v50, %v1711_v62 }
 0x239   :  { %3203 = vtanh.f32 %v1734_v52 }
 0x246   :  { %v3204_v58 = vpop.eup %3203 }
 0x247   :  { %v1737_v35 = vmul.f32 %v3204_v58, %v1736_v25 }
 0x249   :  { %v1746_v36 = vpack.c.bf16 %v1737_v35, %v1737_v35 }
 0x24b   :  { %2790 = vmatmul.mubr.msk.bf16.vlgmr.msra.gmra.mxu0 %vm1779_vm9, %v1746_v36  ;;  %2943 = vmatmul.mubr.msk.bf16.vlgmr.msra.gmra.mxu1 %vm1779_vm9, %v1746_v36  ;;  %v2805_v36 = vld [vmem:[%s4168_s7 + $0x1] ss:$0 sm:$0xff] }
 0x24c   :  { %1980 = vmatprep.mubr.bf16.mxu0 %v3255_v1  ;;  %2950 = vmatprep.mubr.msk.bf16.mxu1 %vm3257_vm8, %v3256_v13 }
 0x24d   :  { %1961 = vmatpush1.bf16.msra.mxu0 %v3159_v51  ;;  %2947 = vmatpush3.bf16.msra.mxu1 %v3162_v24 }
 0x24e   :  { %1962 = vmatprep.subr.bf16.mxu0 %v3165_v29  ;;  %2948 = vmatprep.subr.bf16.mxu1 %v3256_v13 }
 0x251   :  { %1963 = vmatpush1.bf16.msra.mxu0 %v3163_v41  ;;  %2949 = vmatpush3.bf16.msra.mxu1 %v3166_v49 }
 0x252   :  { %2954 = vmatprep.subr.bf16.mxu1 %v3256_v13  ;;  %2111 = vmatprep.subr.bf16.mxu0 %v3169_v42 }
 0x30b   :  { %v1817_v30 = vpop.f32.mrf.mxu0  ;;  %v1858_v22 = vpop.f32.mrf.mxu1 }
 0x30c   :  { %v1864_v33 = vadd.f32 %v1817_v30, %v3996_v55  ;;  %v1878_v11 = vadd.f32 %v2783_v6, %v1858_v22  ;;  %v1901_v6 = vrot.slane %v2794_v61, %v3579_v18 }
 0x30d   :  { %v1819_v43 = vpop.f32.mrf.mxu0  ;;  %v2944_v34 = vpop.f32.mrf.mxu1 }
 0x30e   :  { %v2792_v16 = vmul.f32 -1.442695, %v1864_v33  ;;  %v1871_v27 = vadd.f32 %v1819_v43, %v4000_v2  ;;  %v3175_v43 = vld [vmem:[%s4169_s4 + $0x48] ss:$12 sps:$4 sm:$0xff]   ;;  %v3177_v34 = vld [vmem:[%s4169_s4 + $0x4c] ss:$12 sps:$4 sm:$0xff]  }
 0x30f   :  { %v1821_v32 = vpop.f32.mrf.mxu0  ;;  %v1861_v63 = vpop.f32.mrf.mxu1 }
 0x310   :  { %3205 = vpow2.f32 %v2792_v16  ;;  %v2793_v57 = vmul.f32 -1.442695, %v1871_v27  ;;  %v3178_v16 = vld [vmem:[%s4169_s4 + $0x50] ss:$12 sps:$4 sm:$0xff]   ;;  %v3181_v32 = vld [vmem:[%s4169_s4 + $0x34] ss:$12 sps:$4 sm:$0xff]  }
 0x311   :  { %v1822_v44 = vpop.f32.mrf.mxu0  ;;  %v2945_v56 = vpop.f32.mrf.mxu1  ;;  %v3182_v63 = vld [vmem:[%s4169_s4 + $0x38] ss:$12 sps:$4 sm:$0xff]  }
 0x312   :  { %3207 = vpow2.f32 %v2793_v57  ;;  %v3179_v44 = vld [vmem:[%s4169_s4 + $0x30] ss:$12 sps:$4 sm:$0xff]  }
 0x31d   :  { %v3206_v53 = vpop.eup %3205 }
 0x31e   :  { %v1868_v31 = vadd.f32 1.0, %v3206_v53 }
 0x31f   :  { %v3208_v15 = vpop.eup %3207 }
 0x320   :  { %3209 = vrcp.f32 %v1868_v31  ;;  %v1875_v10 = vadd.f32 1.0, %v3208_v15 }
 0x322   :  { %3211 = vrcp.f32 %v1875_v10 }
 0x32d   :  { %v3210_v59 = vpop.eup %3209 }
 0x32e   :  { %v1879_v55 = vmul.f32 %v3210_v59, %v1878_v11 }
 0x32f   :  { %v3212_v9 = vpop.eup %3211 }
 0x330   :  { %v1880_v47 = vadd.f32 %v1879_v55, %v1711_v62  ;;  %v1882_v54 = vsub.f32 1.0, %v3212_v9  ;;  %v1884_v7 = vmul.f32 %v3212_v9, %v1737_v35 }
 0x332   :  { %3213 = vtanh.f32 %v1880_v47 }
 0x33f   :  { %v3214_v0 = vpop.eup %3213 }
 0x340   :  { %v1883_v38 = vmul.f32 %v3214_v0, %v1882_v54 }
 0x342   :  { %v1885_v17 = vadd.f32 %v1884_v7, %v1883_v38 }
 0x344   :  { %v1886_v2 = vpack.c.bf16 %v1885_v17, %v1737_v35 }
 0x346   :  { %2801 = vmatmul.mubr.msk.bf16.vlgmr.msra.gmra.mxu0 %vm1779_vm9, %v1886_v2  ;;  %2951 = vmatmul.mubr.msk.bf16.vlgmr.msra.gmra.mxu1 %vm1779_vm9, %v1886_v2 }
 0x347   :  { %2131 = vmatprep.mubr.bf16.mxu0 %v3255_v1  ;;  %2958 = vmatprep.mubr.msk.bf16.mxu1 %vm3257_vm8, %v3256_v13 }
 0x348   :  { %2955 = vmatpush3.bf16.msra.mxu1 %v3170_v8  ;;  %2112 = vmatpush1.bf16.msra.mxu0 %v3167_v28 }
 0x349   :  { %2956 = vmatprep.subr.bf16.mxu1 %v3256_v13  ;;  %2113 = vmatprep.subr.bf16.mxu0 %v3173_v60 }
 0x34c   :  { %2957 = vmatpush3.bf16.msra.mxu1 %v3174_v46  ;;  %2114 = vmatpush1.bf16.msra.mxu0 %v3171_v48 }
 0x34d   :  { %2962 = vmatprep.subr.bf16.mxu1 %v3256_v13  ;;  %2277 = vmatprep.subr.bf16.mxu0 %v3177_v34 }
 0x406   :  { %v1982_v39 = vpop.f32.mrf.mxu0  ;;  %v2025_v45 = vpop.f32.mrf.mxu1 }
 0x407   :  { %v1983_v12 = vadd.f32 %v1982_v39, %v1901_v6  ;;  %v2026_v37 = vadd.f32 %v2025_v45, %v1909_v5 }
 0x408   :  { %v2952_v40 = vpop.f32.mrf.mxu1  ;;  %v1984_v50 = vpop.f32.mrf.mxu0 }
 0x409   :  { %v2803_v4 = vmul.f32 -1.442695, %v1983_v12  ;;  %v1985_v14 = vadd.f32 %v1984_v50, %v1905_v26  ;;  %v3186_v50 = vld [vmem:[%s4166_s5 + $0x80] ss:$12 sps:$4 sm:$0xff]  }
 0x40a   :  { %v2028_v20 = vpop.f32.mrf.mxu1  ;;  %v1986_v56 = vpop.f32.mrf.mxu0 }
 0x40b   :  { %3215 = vpow2.f32 %v2803_v4  ;;  %v4065_v21 = vadd.f32 %v2028_v20, %v1909_v5  ;;  %v2804_v52 = vmul.f32 -1.442695, %v1985_v14  ;;  %v1987_v57 = vadd.f32 %v1986_v56, %v1901_v6  ;;  %v3183_v5 = vld [vmem:[%s4166_s5 + $0x78] ss:$12 sps:$4 sm:$0xff]  }
 0x40c   :  { %v2953_v62 = vpop.f32.mrf.mxu1  ;;  %v1988_v27 = vpop.f32.mrf.mxu0  ;;  %v3189_v20 = vld [vmem:[%s4166_s5 + $0x64] ss:$12 sps:$4 sm:$0xff]  }
 0x40d   :  { %3217 = vpow2.f32 %v2804_v52  ;;  %v1989_v9 = vadd.f32 %v1988_v27, %v1905_v26  ;;  %v3185_v26 = vld [vmem:[%s4166_s5 + $0x7c] ss:$12 sps:$4 sm:$0xff]  }
 0x40e   :  { %v2832_v62 = vld [vmem:[%s4167_s6 + $0x2] ss:$4 sm:$0x7] }
 0x40f   :  { %v2218_v14 = vrot.slane %v2832_v62, %v3579_v18 }
 0x418   :  { %v3216_v3 = vpop.eup %3215 }
 0x419   :  { %v2036_v25 = vadd.f32 1.0, %v3216_v3 }
 0x41a   :  { %v3218_v58 = vpop.eup %3217 }
 0x41b   :  { %3219 = vrcp.f32 %v2036_v25  ;;  %v2042_v35 = vadd.f32 1.0, %v3218_v58 }
 0x41d   :  { %3221 = vrcp.f32 %v2042_v35 }
 0x428   :  { %v3220_v51 = vpop.eup %3219 }
 0x429   :  { %v2049_v24 = vmul.f32 %v3220_v51, %v2805_v36  ;;  %v2222_v51 = vrot.slane %v2832_v62, %v3592_v23 }
 0x42a   :  { %v3222_v29 = vpop.eup %3221 }
 0x42b   :  { %v2050_v41 = vadd.f32 %v2049_v24, %v2026_v37  ;;  %v2052_v49 = vsub.f32 1.0, %v3222_v29 }
 0x42d   :  { %3223 = vtanh.f32 %v2050_v41 }
 0x43a   :  { %v3224_v30 = vpop.eup %3223 }
 0x43b   :  { %v2053_v22 = vmul.f32 %v3224_v30, %v2052_v49 }
 0x43d   :  { %v2063_v33 = vpack.c.bf16 %v2053_v22, %v2053_v22 }
 0x43f   :  { %2820 = vmatmul.mubr.msk.bf16.vlgmr.msra.gmra.mxu0 %vm1779_vm9, %v2063_v33  ;;  %2959 = vmatmul.mubr.msk.bf16.vlgmr.msra.gmra.mxu1 %vm1779_vm9, %v2063_v33 }
 0x440   :  { %2297 = vmatprep.mubr.bf16.mxu0 %v3255_v1  ;;  %2966 = vmatprep.mubr.msk.bf16.mxu1 %vm3257_vm8, %v3256_v13 }
 0x441   :  { %2963 = vmatpush3.bf16.msra.mxu1 %v3178_v16  ;;  %2278 = vmatpush1.bf16.msra.mxu0 %v3175_v43 }
 0x442   :  { %2964 = vmatprep.subr.bf16.mxu1 %v3256_v13  ;;  %2279 = vmatprep.subr.bf16.mxu0 %v3181_v32 }
 0x445   :  { %2965 = vmatpush3.bf16.msra.mxu1 %v3182_v63  ;;  %2280 = vmatpush1.bf16.msra.mxu0 %v3179_v44 }
 0x446   :  { %2970 = vmatprep.subr.bf16.mxu1 %v3256_v13  ;;  %2428 = vmatprep.subr.bf16.mxu0 %v3185_v26 }
 0x4ff   :  { %v2133_v53 = vpop.f32.mrf.mxu0  ;;  %v2174_v31 = vpop.f32.mrf.mxu1 }
 0x500   :  { %v2180_v15 = vadd.f32 %v2133_v53, %v1987_v57  ;;  %v2194_v8 = vadd.f32 %v2805_v36, %v2174_v31  ;;  %v2226_v36 = vrot.slane %v2832_v62, %v3581_v19  ;;  %v2843_v19 = vld [vmem:[%s4168_s7 + $0x2] ss:$0 sm:$0xff]  ;;  %v3191_v57 = vld [vmem:[%s4170_s8 + $0x8] sm:$0xff]  }
 0x501   :  { %v2135_v10 = vpop.f32.mrf.mxu0  ;;  %v2960_v11 = vpop.f32.mrf.mxu1  ;;  %v3192_v31 = vld [vmem:[%s4170_s8] sm:$0xff]  }
 0x502   :  { %v2822_v59 = vmul.f32 -1.442695, %v2180_v15  ;;  %v2187_v38 = vadd.f32 %v2135_v10, %v1989_v9  ;;  %v3193_v15 = vld [vmem:[%s4170_s8 + $0x18] sm:$0xff]   ;;  %v3194_v10 = vld [vmem:[%s4170_s8 + $0x10] sm:$0xff]  }
 0x503   :  { %v2137_v55 = vpop.f32.mrf.mxu0  ;;  %v2177_v47 = vpop.f32.mrf.mxu1 }
 0x504   :  { %3225 = vpow2.f32 %v2822_v59  ;;  %v2823_v7 = vmul.f32 -1.442695, %v2187_v38 }
 0x505   :  { %v2138_v54 = vpop.f32.mrf.mxu0  ;;  %v2961_v0 = vpop.f32.mrf.mxu1 }
 0x506   :  { %3227 = vpow2.f32 %v2823_v7 }
 0x511   :  { %v3226_v17 = vpop.eup %3225 }
 0x512   :  { %v2184_v2 = vadd.f32 1.0, %v3226_v17 }
 0x513   :  { %v3228_v28 = vpop.eup %3227 }
 0x514   :  { %3229 = vrcp.f32 %v2184_v2  ;;  %v2191_v42 = vadd.f32 1.0, %v3228_v28 }
 0x516   :  { %3231 = vrcp.f32 %v2191_v42 }
 0x521   :  { %v3230_v60 = vpop.eup %3229 }
 0x522   :  { %v2195_v46 = vmul.f32 %v3230_v60, %v2194_v8 }
 0x523   :  { %v3232_v61 = vpop.eup %3231 }
 0x524   :  { %v2196_v48 = vadd.f32 %v2195_v46, %v4065_v21  ;;  %v2198_v6 = vsub.f32 1.0, %v3232_v61  ;;  %v2200_v12 = vmul.f32 %v3232_v61, %v2053_v22  ;;  %v3187_v21 = vld [vmem:[%s4166_s5 + $0x60] ss:$12 sps:$4 sm:$0xff]  }
 0x526   :  { %3233 = vtanh.f32 %v2196_v48 }
 0x533   :  { %v3234_v39 = vpop.eup %3233 }
 0x534   :  { %v2199_v45 = vmul.f32 %v3234_v39, %v2198_v6 }
 0x536   :  { %v2201_v40 = vadd.f32 %v2200_v12, %v2199_v45 }
 0x538   :  { %v2202_v4 = vpack.c.bf16 %v2201_v40, %v2053_v22 }
 0x53a   :  { %2839 = vmatmul.mubr.msk.bf16.vlgmr.msra.gmra.mxu0 %vm1779_vm9, %v2202_v4  ;;  %2967 = vmatmul.mubr.msk.bf16.vlgmr.msra.gmra.mxu1 %vm1779_vm9, %v2202_v4 }
 0x53b   :  { %2448 = vmatprep.mubr.bf16.mxu0 %v3255_v1  ;;  %2974 = vmatprep.mubr.msk.bf16.mxu1 %vm3257_vm8, %v3256_v13  ;;  %v3190_v1 = vld [vmem:[%s4166_s5 + $0x68] ss:$12 sps:$4 sm:$0xff]  }
 0x53c   :  { %2971 = vmatpush3.bf16.msra.mxu1 %v3186_v50  ;;  %2429 = vmatpush1.bf16.msra.mxu0 %v3183_v5 }
 0x53d   :  { %2972 = vmatprep.subr.bf16.mxu1 %v3256_v13  ;;  %2430 = vmatprep.subr.bf16.mxu0 %v3189_v20 }
 0x540   :  { %2973 = vmatpush3.bf16.msra.mxu1 %v3190_v1  ;;  %2431 = vmatpush1.bf16.msra.mxu0 %v3187_v21 }
 0x541   :  { %2986 = vmatprep.subr.bf16.mxu1 %v3256_v13  ;;  %2978 = vmatprep.subr.bf16.mxu0 %v3256_v13 }
 0x5fa   :  { %v2299_v52 = vpop.f32.mrf.mxu0  ;;  %v2342_v3 = vpop.f32.mrf.mxu1 }
 0x5fb   :  { %v2300_v25 = vadd.f32 %v2299_v52, %v2218_v14  ;;  %v2343_v23 = vadd.f32 %v2342_v3, %v2226_v36 }
 0x5fc   :  { %v2968_v58 = vpop.f32.mrf.mxu1  ;;  %v2301_v37 = vpop.f32.mrf.mxu0 }
 0x5fd   :  { %v2841_v35 = vmul.f32 -1.442695, %v2300_v25  ;;  %v2302_v49 = vadd.f32 %v2301_v37, %v2222_v51  ;;  %v2872_v58 = vld [vmem:[%s4171_s9] ss:$0 sm:$0xff] }
 0x5fe   :  { %v2345_v24 = vpop.f32.mrf.mxu1  ;;  %v2303_v11 = vpop.f32.mrf.mxu0 }
 0x5ff   :  { %3235 = vpow2.f32 %v2841_v35  ;;  %v4128_v41 = vadd.f32 %v2345_v24, %v2226_v36  ;;  %v2842_v30 = vmul.f32 -1.442695, %v2302_v49  ;;  %v2304_v55 = vadd.f32 %v2303_v11, %v2218_v14 }
 0x600   :  { %v2969_v29 = vpop.f32.mrf.mxu1  ;;  %v2305_v59 = vpop.f32.mrf.mxu0 }
 0x601   :  { %3237 = vpow2.f32 %v2842_v30  ;;  %v2306_v28 = vadd.f32 %v2305_v59, %v2222_v51 }
 0x60c   :  { %v3236_v22 = vpop.eup %3235 }
 0x60d   :  { %v2353_v18 = vadd.f32 1.0, %v3236_v22 }
 0x60e   :  { %v3238_v33 = vpop.eup %3237 }
 0x60f   :  { %3239 = vrcp.f32 %v2353_v18  ;;  %v2359_v43 = vadd.f32 1.0, %v3238_v33 }
 0x611   :  { %3241 = vrcp.f32 %v2359_v43 }
 0x61c   :  { %v3240_v34 = vpop.eup %3239 }
 0x61d   :  { %v2366_v16 = vmul.f32 %v3240_v34, %v2843_v19 }
 0x61e   :  { %v3242_v63 = vpop.eup %3241 }
 0x61f   :  { %v2367_v32 = vadd.f32 %v2366_v16, %v2343_v23  ;;  %v2369_v44 = vsub.f32 1.0, %v3242_v63 }
 0x621   :  { %3243 = vtanh.f32 %v2367_v32 }
 0x62e   :  { %v3244_v56 = vpop.eup %3243 }
 0x62f   :  { %v2370_v27 = vmul.f32 %v3244_v56, %v2369_v44 }
 0x631   :  { %v2380_v53 = vpack.c.bf16 %v2370_v27, %v2370_v27 }
 0x633   :  { %2858 = vmatmul.mubr.msk.bf16.vlgmr.msra.gmra.mxu0 %vm1779_vm9, %v2380_v53  ;;  %2975 = vmatmul.mubr.msk.bf16.vlgmr.msra.gmra.mxu1 %vm1779_vm9, %v2380_v53 }
 0x634   :  { %2987 = vmatpush3.bf16.msra.mxu1 %v3191_v57  ;;  %2990 = vmatprep.mubr.msk.bf16.mxu1 %vm3257_vm8, %v3256_v13 }
 0x635   :  { %2988 = vmatprep.subr.bf16.mxu1 %v3256_v13  ;;  %2982 = vmatprep.mubr.msk.bf16.mxu0 %vm3257_vm8, %v3256_v13 }
 0x636   :  { %2979 = vmatpush3.bf16.msra.mxu0 %v3193_v15 }
 0x637   :  { %2980 = vmatprep.subr.bf16.mxu0 %v3256_v13 }
 0x638   :  { %2989 = vmatpush3.bf16.msra.mxu1 %v3192_v31 }
 0x63a   :  { %2981 = vmatpush3.bf16.msra.mxu0 %v3194_v10 }
 0x63b   :  { %2991 = vmatmul.mubr.msk.bf16.vlgmr.msra.gmra.mxu1 %vm1779_vm9, %v2380_v53 }
 0x6f3   :  { %v2450_v47 = vpop.f32.mrf.mxu0  ;;  %v2491_v9 = vpop.f32.mrf.mxu1 }
 0x6f4   :  { %v2497_v54 = vadd.f32 %v2450_v47, %v2304_v55  ;;  %v2511_v4 = vadd.f32 %v2843_v19, %v2491_v9 }
 0x6f5   :  { %v2452_v0 = vpop.f32.mrf.mxu0  ;;  %v2976_v38 = vpop.f32.mrf.mxu1 }
 0x6f6   :  { %v2860_v7 = vmul.f32 -1.442695, %v2497_v54  ;;  %v2504_v60 = vadd.f32 %v2452_v0, %v2306_v28 }
 0x6f7   :  { %v2454_v17 = vpop.f32.mrf.mxu0  ;;  %v2494_v2 = vpop.f32.mrf.mxu1 }
 0x6f8   :  { %3245 = vpow2.f32 %v2860_v7  ;;  %v2861_v13 = vmul.f32 -1.442695, %v2504_v60 }
 0x6f9   :  { %v2455_v42 = vpop.f32.mrf.mxu0  ;;  %v2977_v8 = vpop.f32.mrf.mxu1 }
 0x6fa   :  { %3247 = vpow2.f32 %v2861_v13 }
 0x6fb   :  { %v2630_v46 = vpop.f32.mrf.mxu1 }
 0x6fd   :  { %v2992_v48 = vpop.f32.mrf.mxu1 }
 0x6ff   :  { %v2633_v61 = vpop.f32.mrf.mxu1 }
 0x701   :  { %v2993_v6 = vpop.f32.mrf.mxu1 }
 0x705   :  { %v3246_v39 = vpop.eup %3245 }
 0x706   :  { %v2501_v45 = vadd.f32 1.0, %v3246_v39 }
 0x707   :  { %v3248_v12 = vpop.eup %3247 }
 0x708   :  { %3249 = vrcp.f32 %v2501_v45  ;;  %v2508_v40 = vadd.f32 1.0, %v3248_v12 }
 0x70a   :  { %3251 = vrcp.f32 %v2508_v40 }
 0x715   :  { %v3250_v5 = vpop.eup %3249 }
 0x716   :  { %v2512_v26 = vmul.f32 %v3250_v5, %v2511_v4 }
 0x717   :  { %v3252_v20 = vpop.eup %3251 }
 0x718   :  { %v2513_v50 = vadd.f32 %v2512_v26, %v4128_v41  ;;  %v2515_v1 = vsub.f32 1.0, %v3252_v20  ;;  %v2517_v14 = vmul.f32 %v3252_v20, %v2370_v27 }
 0x71a   :  { %3253 = vtanh.f32 %v2513_v50 }
 0x727   :  { %v3254_v21 = vpop.eup %3253 }
 0x728   :  { %v2516_v62 = vmul.f32 %v3254_v21, %v2515_v1 }
 0x72a   :  { %v2518_v52 = vadd.f32 %v2517_v14, %v2516_v62 }
 0x72c   :  { %v2523_v3 = vpack.c.bf16 %v2518_v52, %v2518_v52 }
 0x72e   :  { %2983 = vmatmul.mubr.msk.bf16.vlgmr.msra.gmra.mxu0 %vm1779_vm9, %v2523_v3 }
 0x7ee   :  { %v2578_v25 = vpop.f32.mrf.mxu0 }
 0x7ef   :  { %v2631_v35 = vadd.f32 %v2630_v46, %v2578_v25 }
 0x7f0   :  { %v2984_v36 = vpop.f32.mrf.mxu0 }
 0x7f1   :  { %v2643_v51 = vadd.f32 %v2872_v58, %v2631_v35 }
 0x7f2   :  { %v2581_v37 = vpop.f32.mrf.mxu0 }
 0x7f3   :  { %2644 = vst [vmem:[%s4172_s10] sm:$0xff] %v2643_v51 }
 0x7f4   :  { %v2985_v24 = vpop.f32.mrf.mxu0 }

</bundles_post_ra>
